<compile_context>
chip_gen: v7x
topology: tpu7x:2x2x1
jax: 0.10.0
libtpu: 0.0.40
codegen_flags: <defaults>
</compile_context>

<pallas_src>
import jax
import jax.numpy as jnp
import numpy as np
from jax.experimental import pallas as pl
from jax.experimental.pallas import tpu as pltpu


def _round_up(x, m):
    return (x + m - 1) // m * m


# ---------------------------------------------------------------------------
# Fused forward kernel (one batch tile per grid step)
# ---------------------------------------------------------------------------
def mnist_fused_kernel(x_ref, w1e_ref, w1o_ref, b1_ref,
                       w2e_ref, w2o_ref, b2_ref,
                       wf1_ref, bf1_ref, wf2_ref, bf2_ref, o_ref):
    """Whole XlaMNIST forward for one batch tile.

    x_ref:   (28, TB, 28)   input images, (row h, batch b, col w).
    w1e/w1o: (5, 28, 120)   conv1 width-folded weights, even/odd output cols;
                            lane index = pooled_col*10 + channel.
    b1_ref:  (1, 120)       conv1 bias tiled over pooled cols.
    w2e/w2o: (5, 120, 80)   conv2 width-folded weights; lane-in = col*10+cin,
                            lane-out = pooled_col*20 + cout.
    b2_ref:  (1, 80)        conv2 bias tiled over pooled cols.
    wf1_ref: (4, 80, 50)    fc1 weights regrouped per pooled row.
    bf1_ref: (1, 50), wf2_ref: (50, 10), bf2_ref: (1, 10).
    o_ref:   (TB, 10)       log-probabilities.
    """
    tb = x_ref.shape[1]
    x = x_ref[...]                                    # (28, TB, 28)
    w1e = w1e_ref[...]
    w1o = w1o_ref[...]

    # ---- conv1 as 5 accumulated matmuls per column parity ----
    ye = jnp.zeros((24 * tb, 120), jnp.float32)       # rows = (out_row, b)
    yo = jnp.zeros((24 * tb, 120), jnp.float32)
    for d in range(5):                                # kernel row offset
        lhs = x[d:d + 24].reshape(24 * tb, 28)        # leading/sublane merge
        ye = ye + jnp.dot(lhs, w1e[d], preferred_element_type=jnp.float32)
        yo = yo + jnp.dot(lhs, w1o[d], preferred_element_type=jnp.float32)
    # 2x2 max-pool: col pairs are the (even, odd) streams, row pairs are
    # adjacent leading slabs after the layout-preserving split.
    ye = ye.reshape(24, tb, 120).reshape(12, 2, tb, 120)
    yo = yo.reshape(24, tb, 120).reshape(12, 2, tb, 120)
    a1 = jnp.maximum(jnp.maximum(ye[:, 0], ye[:, 1]),
                     jnp.maximum(yo[:, 0], yo[:, 1]))  # (12, TB, 120)
    a1 = jnp.maximum(a1 + b1_ref[...], 0.0)            # bias + ReLU

    # ---- conv2 (same scheme, 10 channels in / 20 out) ----
    w2e = w2e_ref[...]
    w2o = w2o_ref[...]
    ze = jnp.zeros((8 * tb, 80), jnp.float32)
    zo = jnp.zeros((8 * tb, 80), jnp.float32)
    for d in range(5):
        lhs2 = a1[d:d + 8].reshape(8 * tb, 120)
        ze = ze + jnp.dot(lhs2, w2e[d], preferred_element_type=jnp.float32)
        zo = zo + jnp.dot(lhs2, w2o[d], preferred_element_type=jnp.float32)
    ze = ze.reshape(8, tb, 80).reshape(4, 2, tb, 80)
    zo = zo.reshape(8, tb, 80).reshape(4, 2, tb, 80)
    a2 = jnp.maximum(jnp.maximum(ze[:, 0], ze[:, 1]),
                     jnp.maximum(zo[:, 0], zo[:, 1]))  # (4, TB, 80)
    a2 = jnp.maximum(a2 + b2_ref[...], 0.0)            # bias + ReLU

    # ---- fc1 (4-term batched matmul over pooled rows) + ReLU ----
    h = jnp.einsum("ubk,ukf->ubf", a2, wf1_ref[...],
                   preferred_element_type=jnp.float32).sum(axis=0)  # (TB, 50)
    h = jnp.maximum(h + bf1_ref[...], 0.0)

    # ---- fc2 + log_softmax ----
    z = jnp.dot(h, wf2_ref[...], preferred_element_type=jnp.float32) + bf2_ref[...]
    z = z - jnp.max(z, axis=-1, keepdims=True)
    o_ref[...] = z - jnp.log(jnp.sum(jnp.exp(z), axis=-1, keepdims=True))


# ---------------------------------------------------------------------------
# Glue: weight folding (tiny, done once per trace) and tiling selection
# ---------------------------------------------------------------------------
def _parity_selector(kw, w_in, n_out, parity):
    """E[j, w, u] = 1  iff  w == 2*u + parity + j  (numpy constant)."""
    e = np.zeros((kw, w_in, n_out), np.float32)
    for j in range(kw):
        for u in range(n_out):
            w = 2 * u + parity + j
            if w < w_in:
                e[j, w, u] = 1.0
    return e


def _prepare_kernel_operands(params):
    # conv1: fold the width dim into a (28 -> 12*10) structured-sparse matrix
    # per kernel row and column parity.  Lane order = pooled_col*10 + channel.
    w1 = params["conv1_w"][:, 0]                         # (10, 5, 5) (c, d, j)
    e1e = _parity_selector(5, 28, 12, 0)
    e1o = _parity_selector(5, 28, 12, 1)
    w1e = jnp.einsum("jwu,cdj->dwuc", e1e, w1).reshape(5, 28, 120)
    w1o = jnp.einsum("jwu,cdj->dwuc", e1o, w1).reshape(5, 28, 120)
    b1 = jnp.tile(params["conv1_b"], 12).reshape(1, 120)

    # conv2: lane-in = col*10 + cin (matches a1), lane-out = pooled_col*20 + cout.
    w2 = params["conv2_w"]                               # (20, 10, 5, 5)
    e2e = _parity_selector(5, 12, 4, 0)
    e2o = _parity_selector(5, 12, 4, 1)
    w2e = jnp.einsum("jmv,oidj->dmivo", e2e, w2).reshape(5, 120, 80)
    w2o = jnp.einsum("jmv,oidj->dmivo", e2o, w2).reshape(5, 120, 80)
    b2 = jnp.tile(params["conv2_b"], 4).reshape(1, 80)

    # fc1 rows are PyTorch's (c, h, w) flatten order -> regroup to
    # [pooled row u][lane = pooled_col*20 + c][out].
    wf1 = params["fc1_w"].reshape(20, 4, 4, 50).transpose(1, 2, 0, 3).reshape(4, 80, 50)
    bf1 = params["fc1_b"].reshape(1, 50)
    wf2 = params["fc2_w"]
    bf2 = params["fc2_b"].reshape(1, 10)
    return (w1e, w1o, b1, w2e, w2o, b2, wf1, bf1, wf2, bf2)


def _device_caps():
    """(max batch tile, vmem_limit_bytes) per generation."""
    kind = ""
    try:
        kind = jax.devices()[0].device_kind.lower()
    except Exception:
        pass
    if "v5 lite" in kind or "v5e" in kind or "v5litepod" in kind or "v6" in kind:
        return 256, 96 * 1024 * 1024       # 128 MiB VMEM parts: bigger tiles
    return 128, 40 * 1024 * 1024           # safe default (v7x: 64 MiB VMEM/TC)


def _batch_tiling(batch):
    cap, vmem_limit = _device_caps()
    b8 = _round_up(max(batch, 1), 8)
    if b8 <= 8:
        tb = 8
    elif b8 <= cap:
        tb = _round_up((b8 + 1) // 2, 8)   # >=2 grid steps -> both v7x TCs busy
    else:
        tb = cap
    b_pad = _round_up(b8, tb)              # tiles divide the padded batch exactly
    return tb, b_pad, vmem_limit


def xla_mnist_forward(x, params):
    """x: (B, 1, 28, 28) float32 NCHW -> (B, 10) log-probabilities."""
    B = x.shape[0]
    tb, b_pad, vmem_limit = _batch_tiling(B)

    xhbw = x[:, 0].transpose(1, 0, 2)      # (28, B, 28)  = (row, batch, col)
    if b_pad != B:
        xhbw = jnp.pad(xhbw, ((0, 0), (0, b_pad - B), (0, 0)))

    ops = _prepare_kernel_operands(params)

    flops = int(b_pad * (10 * 2 * 24 * 28 * 120 + 10 * 2 * 8 * 120 * 80
                         + 4 * 2 * 80 * 50 + 2 * 50 * 10))
    bytes_accessed = int(4 * (b_pad * (28 * 28 + 10)
                              + 2 * 5 * 28 * 120 + 2 * 5 * 120 * 80
                              + 4 * 80 * 50 + 50 * 10 + 260))

    out = pl.pallas_call(
        mnist_fused_kernel,
        out_shape=jax.ShapeDtypeStruct((b_pad, 10), jnp.float32),
        grid=(b_pad // tb,),
        in_specs=[
            pl.BlockSpec((28, tb, 28), lambda i: (0, i, 0)),
            pl.BlockSpec((5, 28, 120), lambda i: (0, 0, 0)),   # resident weights
            pl.BlockSpec((5, 28, 120), lambda i: (0, 0, 0)),
            pl.BlockSpec((1, 120), lambda i: (0, 0)),
            pl.BlockSpec((5, 120, 80), lambda i: (0, 0, 0)),
            pl.BlockSpec((5, 120, 80), lambda i: (0, 0, 0)),
            pl.BlockSpec((1, 80), lambda i: (0, 0)),
            pl.BlockSpec((4, 80, 50), lambda i: (0, 0, 0)),
            pl.BlockSpec((1, 50), lambda i: (0, 0)),
            pl.BlockSpec((50, 10), lambda i: (0, 0)),
            pl.BlockSpec((1, 10), lambda i: (0, 0)),
        ],
        out_specs=pl.BlockSpec((tb, 10), lambda i: (i, 0)),
        compiler_params=pltpu.CompilerParams(
            dimension_semantics=("parallel",),        # megacore shard on v7x
            vmem_limit_bytes=vmem_limit),
        cost_estimate=pl.CostEstimate(flops=flops,
                                      transcendentals=int(11 * b_pad),
                                      bytes_accessed=bytes_accessed),
    )(xhbw, *ops)
    return out[:B]


# ---------------------------------------------------------------------------
# Deterministic parameter init (PyTorch-default-style uniform bounds)
# ---------------------------------------------------------------------------
def init_params(key):
    ks = jax.random.split(key, 8)

    def uni(k, shape, fan_in):
        bound = 1.0 / float(np.sqrt(fan_in))
        return jax.random.uniform(k, shape, jnp.float32, -bound, bound)

    return {
        "conv1_w": uni(ks[0], (10, 1, 5, 5), 1 * 5 * 5),
        "conv1_b": uni(ks[1], (10,), 1 * 5 * 5),
        "conv2_w": uni(ks[2], (20, 10, 5, 5), 10 * 5 * 5),
        "conv2_b": uni(ks[3], (20,), 10 * 5 * 5),
        "fc1_w": uni(ks[4], (320, 50), 320),   # (in, out) = W.T, rows in (c,h,w) order
        "fc1_b": uni(ks[5], (1, 50), 320),
        "fc2_w": uni(ks[6], (50, 10), 50),
        "fc2_b": uni(ks[7], (1, 10), 50),
    }


# ---------------------------------------------------------------------------
# Pure-JAX reference (correctness sanity check)
# ---------------------------------------------------------------------------
def reference_forward(x, params):
    def conv_block(y, w, b):
        y = jax.lax.conv_general_dilated(
            y, w, (1, 1), "VALID", dimension_numbers=("NCHW", "OIHW", "NCHW"))
        y = y + b.reshape(1, -1, 1, 1)
        y = jax.lax.reduce_window(y, -jnp.inf, jax.lax.max,
                                  (1, 1, 2, 2), (1, 1, 2, 2), "VALID")
        return jnp.maximum(y, 0.0)

    y = conv_block(x, params["conv1_w"], params["conv1_b"])
    y = conv_block(y, params["conv2_w"], params["conv2_b"])
    y = y.reshape(y.shape[0], 320)
    h = jnp.maximum(y @ params["fc1_w"] + params["fc1_b"], 0.0)
    z = h @ params["fc2_w"] + params["fc2_b"]
    return jax.nn.log_softmax(z, axis=1)


if __name__ == "__main__":
    key = jax.random.PRNGKey(0)
    k_x, k_p = jax.random.split(key)
    x = jax.random.normal(k_x, (2, 1, 28, 28), dtype=jnp.float32)
    params = init_params(k_p)

    out = jax.block_until_ready(jax.jit(xla_mnist_forward)(x, params))
    assert out.shape == (2, 10), out.shape

    ref = jax.block_until_ready(jax.jit(reference_forward)(x, params))
    np.testing.assert_allclose(np.asarray(out), np.asarray(ref),
                               rtol=1e-3, atol=1e-4)
    # rows of log_softmax must exp-sum to 1
    np.testing.assert_allclose(np.exp(np.asarray(out)).sum(axis=1),
                               np.ones(2), rtol=1e-5, atol=1e-5)
    print("KERNEL_OK")
</pallas_src>

<mosaic_0001>
module attributes {stable_mosaic.version = 11 : i64} {
  func.func @mnist_fused_kernel(%arg0: i32, %arg1: memref<28x8x28xf32, #tpu.memory_space<vmem>>, %arg2: memref<5x28x120xf32, #tpu.memory_space<vmem>>, %arg3: memref<5x28x120xf32, #tpu.memory_space<vmem>>, %arg4: memref<1x120xf32, #tpu.memory_space<vmem>>, %arg5: memref<5x120x80xf32, #tpu.memory_space<vmem>>, %arg6: memref<5x120x80xf32, #tpu.memory_space<vmem>>, %arg7: memref<1x80xf32, #tpu.memory_space<vmem>>, %arg8: memref<4x80x50xf32, #tpu.memory_space<vmem>>, %arg9: memref<1x50xf32, #tpu.memory_space<vmem>>, %arg10: memref<50x10xf32, #tpu.memory_space<vmem>>, %arg11: memref<1x10xf32, #tpu.memory_space<vmem>>, %arg12: memref<8x10xf32, #tpu.memory_space<vmem>>) attributes {dimension_semantics = [#tpu.dimension_semantics<parallel>], iteration_bounds = array<i64: 1>, scalar_prefetch = 0 : i64, scratch_operands = 0 : i64, tpu.core_type = #tpu.core_type<tc>, window_params = [{transform_indices = @transform_0, window_bounds = array<i64: 28, 8, 28>}, {pipeline_mode = #tpu.pipeline_mode<synchronous>, transform_indices = @transform_1, window_bounds = array<i64: 5, 28, 120>}, {pipeline_mode = #tpu.pipeline_mode<synchronous>, transform_indices = @transform_2, window_bounds = array<i64: 5, 28, 120>}, {pipeline_mode = #tpu.pipeline_mode<synchronous>, transform_indices = @transform_3, window_bounds = array<i64: 1, 120>}, {pipeline_mode = #tpu.pipeline_mode<synchronous>, transform_indices = @transform_4, window_bounds = array<i64: 5, 120, 80>}, {pipeline_mode = #tpu.pipeline_mode<synchronous>, transform_indices = @transform_5, window_bounds = array<i64: 5, 120, 80>}, {pipeline_mode = #tpu.pipeline_mode<synchronous>, transform_indices = @transform_6, window_bounds = array<i64: 1, 80>}, {pipeline_mode = #tpu.pipeline_mode<synchronous>, transform_indices = @transform_7, window_bounds = array<i64: 4, 80, 50>}, {pipeline_mode = #tpu.pipeline_mode<synchronous>, transform_indices = @transform_8, window_bounds = array<i64: 1, 50>}, {pipeline_mode = #tpu.pipeline_mode<synchronous>, transform_indices = @transform_9, window_bounds = array<i64: 50, 10>}, {pipeline_mode = #tpu.pipeline_mode<synchronous>, transform_indices = @transform_10, window_bounds = array<i64: 1, 10>}, {transform_indices = @transform_11, window_bounds = array<i64: 8, 10>}]} {
    %c0 = arith.constant 0 : index
    %c0_0 = arith.constant 0 : index
    %c0_1 = arith.constant 0 : index
    %0 = vector.load %arg1[%c0, %c0_0, %c0_1] : memref<28x8x28xf32, #tpu.memory_space<vmem>>, vector<28x8x28xf32>
    %c0_2 = arith.constant 0 : index
    %c0_3 = arith.constant 0 : index
    %c0_4 = arith.constant 0 : index
    %1 = vector.load %arg2[%c0_2, %c0_3, %c0_4] : memref<5x28x120xf32, #tpu.memory_space<vmem>>, vector<5x28x120xf32>
    %c0_5 = arith.constant 0 : index
    %c0_6 = arith.constant 0 : index
    %c0_7 = arith.constant 0 : index
    %2 = vector.load %arg3[%c0_5, %c0_6, %c0_7] : memref<5x28x120xf32, #tpu.memory_space<vmem>>, vector<5x28x120xf32>
    %cst = arith.constant 0.000000e+00 : f32
    %3 = vector.broadcast %cst : f32 to vector<192x120xf32>
    %cst_8 = arith.constant 0.000000e+00 : f32
    %4 = vector.broadcast %cst_8 : f32 to vector<192x120xf32>
    %5 = vector.extract_strided_slice %0 {offsets = [0, 0, 0], sizes = [24, 8, 28], strides = [1, 1, 1]} : vector<28x8x28xf32> to vector<24x8x28xf32>
    %6 = vector.shape_cast %5 : vector<24x8x28xf32> to vector<192x28xf32>
    %7 = vector.extract_strided_slice %1 {offsets = [0, 0, 0], sizes = [1, 28, 120], strides = [1, 1, 1]} : vector<5x28x120xf32> to vector<1x28x120xf32>
    %8 = vector.shape_cast %7 : vector<1x28x120xf32> to vector<28x120xf32>
    %cst_9 = arith.constant dense<0.000000e+00> : vector<192x120xf32>
    %9 = tpu.matmul %6, %8, %cst_9 {dimension_numbers = #tpu.dot_dimension_numbers<[1], [0], [0], [1], [0, 0, 1, 1], [], []>} : vector<192x28xf32>, vector<28x120xf32>, vector<192x120xf32> -> vector<192x120xf32>
    %10 = arith.addf %3, %9 : vector<192x120xf32>
    %11 = vector.extract_strided_slice %2 {offsets = [0, 0, 0], sizes = [1, 28, 120], strides = [1, 1, 1]} : vector<5x28x120xf32> to vector<1x28x120xf32>
    %12 = vector.shape_cast %11 : vector<1x28x120xf32> to vector<28x120xf32>
    %cst_10 = arith.constant dense<0.000000e+00> : vector<192x120xf32>
    %13 = tpu.matmul %6, %12, %cst_10 {dimension_numbers = #tpu.dot_dimension_numbers<[1], [0], [0], [1], [0, 0, 1, 1], [], []>} : vector<192x28xf32>, vector<28x120xf32>, vector<192x120xf32> -> vector<192x120xf32>
    %14 = arith.addf %4, %13 : vector<192x120xf32>
    %15 = vector.extract_strided_slice %0 {offsets = [1, 0, 0], sizes = [24, 8, 28], strides = [1, 1, 1]} : vector<28x8x28xf32> to vector<24x8x28xf32>
    %16 = vector.shape_cast %15 : vector<24x8x28xf32> to vector<192x28xf32>
    %17 = vector.extract_strided_slice %1 {offsets = [1, 0, 0], sizes = [1, 28, 120], strides = [1, 1, 1]} : vector<5x28x120xf32> to vector<1x28x120xf32>
    %18 = vector.shape_cast %17 : vector<1x28x120xf32> to vector<28x120xf32>
    %cst_11 = arith.constant dense<0.000000e+00> : vector<192x120xf32>
    %19 = tpu.matmul %16, %18, %cst_11 {dimension_numbers = #tpu.dot_dimension_numbers<[1], [0], [0], [1], [0, 0, 1, 1], [], []>} : vector<192x28xf32>, vector<28x120xf32>, vector<192x120xf32> -> vector<192x120xf32>
    %20 = arith.addf %10, %19 : vector<192x120xf32>
    %21 = vector.extract_strided_slice %2 {offsets = [1, 0, 0], sizes = [1, 28, 120], strides = [1, 1, 1]} : vector<5x28x120xf32> to vector<1x28x120xf32>
    %22 = vector.shape_cast %21 : vector<1x28x120xf32> to vector<28x120xf32>
    %cst_12 = arith.constant dense<0.000000e+00> : vector<192x120xf32>
    %23 = tpu.matmul %16, %22, %cst_12 {dimension_numbers = #tpu.dot_dimension_numbers<[1], [0], [0], [1], [0, 0, 1, 1], [], []>} : vector<192x28xf32>, vector<28x120xf32>, vector<192x120xf32> -> vector<192x120xf32>
    %24 = arith.addf %14, %23 : vector<192x120xf32>
    %25 = vector.extract_strided_slice %0 {offsets = [2, 0, 0], sizes = [24, 8, 28], strides = [1, 1, 1]} : vector<28x8x28xf32> to vector<24x8x28xf32>
    %26 = vector.shape_cast %25 : vector<24x8x28xf32> to vector<192x28xf32>
    %27 = vector.extract_strided_slice %1 {offsets = [2, 0, 0], sizes = [1, 28, 120], strides = [1, 1, 1]} : vector<5x28x120xf32> to vector<1x28x120xf32>
    %28 = vector.shape_cast %27 : vector<1x28x120xf32> to vector<28x120xf32>
    %cst_13 = arith.constant dense<0.000000e+00> : vector<192x120xf32>
    %29 = tpu.matmul %26, %28, %cst_13 {dimension_numbers = #tpu.dot_dimension_numbers<[1], [0], [0], [1], [0, 0, 1, 1], [], []>} : vector<192x28xf32>, vector<28x120xf32>, vector<192x120xf32> -> vector<192x120xf32>
    %30 = arith.addf %20, %29 : vector<192x120xf32>
    %31 = vector.extract_strided_slice %2 {offsets = [2, 0, 0], sizes = [1, 28, 120], strides = [1, 1, 1]} : vector<5x28x120xf32> to vector<1x28x120xf32>
    %32 = vector.shape_cast %31 : vector<1x28x120xf32> to vector<28x120xf32>
    %cst_14 = arith.constant dense<0.000000e+00> : vector<192x120xf32>
    %33 = tpu.matmul %26, %32, %cst_14 {dimension_numbers = #tpu.dot_dimension_numbers<[1], [0], [0], [1], [0, 0, 1, 1], [], []>} : vector<192x28xf32>, vector<28x120xf32>, vector<192x120xf32> -> vector<192x120xf32>
    %34 = arith.addf %24, %33 : vector<192x120xf32>
    %35 = vector.extract_strided_slice %0 {offsets = [3, 0, 0], sizes = [24, 8, 28], strides = [1, 1, 1]} : vector<28x8x28xf32> to vector<24x8x28xf32>
    %36 = vector.shape_cast %35 : vector<24x8x28xf32> to vector<192x28xf32>
    %37 = vector.extract_strided_slice %1 {offsets = [3, 0, 0], sizes = [1, 28, 120], strides = [1, 1, 1]} : vector<5x28x120xf32> to vector<1x28x120xf32>
    %38 = vector.shape_cast %37 : vector<1x28x120xf32> to vector<28x120xf32>
    %cst_15 = arith.constant dense<0.000000e+00> : vector<192x120xf32>
    %39 = tpu.matmul %36, %38, %cst_15 {dimension_numbers = #tpu.dot_dimension_numbers<[1], [0], [0], [1], [0, 0, 1, 1], [], []>} : vector<192x28xf32>, vector<28x120xf32>, vector<192x120xf32> -> vector<192x120xf32>
    %40 = arith.addf %30, %39 : vector<192x120xf32>
    %41 = vector.extract_strided_slice %2 {offsets = [3, 0, 0], sizes = [1, 28, 120], strides = [1, 1, 1]} : vector<5x28x120xf32> to vector<1x28x120xf32>
    %42 = vector.shape_cast %41 : vector<1x28x120xf32> to vector<28x120xf32>
    %cst_16 = arith.constant dense<0.000000e+00> : vector<192x120xf32>
    %43 = tpu.matmul %36, %42, %cst_16 {dimension_numbers = #tpu.dot_dimension_numbers<[1], [0], [0], [1], [0, 0, 1, 1], [], []>} : vector<192x28xf32>, vector<28x120xf32>, vector<192x120xf32> -> vector<192x120xf32>
    %44 = arith.addf %34, %43 : vector<192x120xf32>
    %45 = vector.extract_strided_slice %0 {offsets = [4, 0, 0], sizes = [24, 8, 28], strides = [1, 1, 1]} : vector<28x8x28xf32> to vector<24x8x28xf32>
    %46 = vector.shape_cast %45 : vector<24x8x28xf32> to vector<192x28xf32>
    %47 = vector.extract_strided_slice %1 {offsets = [4, 0, 0], sizes = [1, 28, 120], strides = [1, 1, 1]} : vector<5x28x120xf32> to vector<1x28x120xf32>
    %48 = vector.shape_cast %47 : vector<1x28x120xf32> to vector<28x120xf32>
    %cst_17 = arith.constant dense<0.000000e+00> : vector<192x120xf32>
    %49 = tpu.matmul %46, %48, %cst_17 {dimension_numbers = #tpu.dot_dimension_numbers<[1], [0], [0], [1], [0, 0, 1, 1], [], []>} : vector<192x28xf32>, vector<28x120xf32>, vector<192x120xf32> -> vector<192x120xf32>
    %50 = arith.addf %40, %49 : vector<192x120xf32>
    %51 = vector.extract_strided_slice %2 {offsets = [4, 0, 0], sizes = [1, 28, 120], strides = [1, 1, 1]} : vector<5x28x120xf32> to vector<1x28x120xf32>
    %52 = vector.shape_cast %51 : vector<1x28x120xf32> to vector<28x120xf32>
    %cst_18 = arith.constant dense<0.000000e+00> : vector<192x120xf32>
    %53 = tpu.matmul %46, %52, %cst_18 {dimension_numbers = #tpu.dot_dimension_numbers<[1], [0], [0], [1], [0, 0, 1, 1], [], []>} : vector<192x28xf32>, vector<28x120xf32>, vector<192x120xf32> -> vector<192x120xf32>
    %54 = arith.addf %44, %53 : vector<192x120xf32>
    %55 = vector.shape_cast %50 : vector<192x120xf32> to vector<24x8x120xf32>
    %56 = vector.shape_cast %55 : vector<24x8x120xf32> to vector<12x2x8x120xf32>
    %57 = vector.shape_cast %54 : vector<192x120xf32> to vector<24x8x120xf32>
    %58 = vector.shape_cast %57 : vector<24x8x120xf32> to vector<12x2x8x120xf32>
    %59 = vector.extract_strided_slice %56 {offsets = [0, 0, 0, 0], sizes = [12, 1, 8, 120], strides = [1, 1, 1, 1]} : vector<12x2x8x120xf32> to vector<12x1x8x120xf32>
    %60 = vector.shape_cast %59 : vector<12x1x8x120xf32> to vector<12x8x120xf32>
    %61 = vector.extract_strided_slice %56 {offsets = [0, 1, 0, 0], sizes = [12, 1, 8, 120], strides = [1, 1, 1, 1]} : vector<12x2x8x120xf32> to vector<12x1x8x120xf32>
    %62 = vector.shape_cast %61 : vector<12x1x8x120xf32> to vector<12x8x120xf32>
    %63 = arith.maximumf %60, %62 : vector<12x8x120xf32>
    %64 = vector.extract_strided_slice %58 {offsets = [0, 0, 0, 0], sizes = [12, 1, 8, 120], strides = [1, 1, 1, 1]} : vector<12x2x8x120xf32> to vector<12x1x8x120xf32>
    %65 = vector.shape_cast %64 : vector<12x1x8x120xf32> to vector<12x8x120xf32>
    %66 = vector.extract_strided_slice %58 {offsets = [0, 1, 0, 0], sizes = [12, 1, 8, 120], strides = [1, 1, 1, 1]} : vector<12x2x8x120xf32> to vector<12x1x8x120xf32>
    %67 = vector.shape_cast %66 : vector<12x1x8x120xf32> to vector<12x8x120xf32>
    %68 = arith.maximumf %65, %67 : vector<12x8x120xf32>
    %69 = arith.maximumf %63, %68 : vector<12x8x120xf32>
    %c0_19 = arith.constant 0 : index
    %c0_20 = arith.constant 0 : index
    %70 = vector.load %arg4[%c0_19, %c0_20] : memref<1x120xf32, #tpu.memory_space<vmem>>, vector<1x120xf32>
    %71 = vector.shape_cast %70 : vector<1x120xf32> to vector<1x1x120xf32>
    %72 = vector.broadcast %71 : vector<1x1x120xf32> to vector<12x8x120xf32>
    %73 = arith.addf %69, %72 : vector<12x8x120xf32>
    %cst_21 = arith.constant 0.000000e+00 : f32
    %74 = vector.broadcast %cst_21 : f32 to vector<12x8x120xf32>
    %75 = arith.maximumf %73, %74 : vector<12x8x120xf32>
    %c0_22 = arith.constant 0 : index
    %c0_23 = arith.constant 0 : index
    %c0_24 = arith.constant 0 : index
    %76 = vector.load %arg5[%c0_22, %c0_23, %c0_24] : memref<5x120x80xf32, #tpu.memory_space<vmem>>, vector<5x120x80xf32>
    %c0_25 = arith.constant 0 : index
    %c0_26 = arith.constant 0 : index
    %c0_27 = arith.constant 0 : index
    %77 = vector.load %arg6[%c0_25, %c0_26, %c0_27] : memref<5x120x80xf32, #tpu.memory_space<vmem>>, vector<5x120x80xf32>
    %cst_28 = arith.constant 0.000000e+00 : f32
    %78 = vector.broadcast %cst_28 : f32 to vector<64x80xf32>
    %cst_29 = arith.constant 0.000000e+00 : f32
    %79 = vector.broadcast %cst_29 : f32 to vector<64x80xf32>
    %80 = vector.extract_strided_slice %75 {offsets = [0, 0, 0], sizes = [8, 8, 120], strides = [1, 1, 1]} : vector<12x8x120xf32> to vector<8x8x120xf32>
    %81 = vector.shape_cast %80 : vector<8x8x120xf32> to vector<64x120xf32>
    %82 = vector.extract_strided_slice %76 {offsets = [0, 0, 0], sizes = [1, 120, 80], strides = [1, 1, 1]} : vector<5x120x80xf32> to vector<1x120x80xf32>
    %83 = vector.shape_cast %82 : vector<1x120x80xf32> to vector<120x80xf32>
    %cst_30 = arith.constant dense<0.000000e+00> : vector<64x80xf32>
    %84 = tpu.matmul %81, %83, %cst_30 {dimension_numbers = #tpu.dot_dimension_numbers<[1], [0], [0], [1], [0, 0, 1, 1], [], []>} : vector<64x120xf32>, vector<120x80xf32>, vector<64x80xf32> -> vector<64x80xf32>
    %85 = arith.addf %78, %84 : vector<64x80xf32>
    %86 = vector.extract_strided_slice %77 {offsets = [0, 0, 0], sizes = [1, 120, 80], strides = [1, 1, 1]} : vector<5x120x80xf32> to vector<1x120x80xf32>
    %87 = vector.shape_cast %86 : vector<1x120x80xf32> to vector<120x80xf32>
    %cst_31 = arith.constant dense<0.000000e+00> : vector<64x80xf32>
    %88 = tpu.matmul %81, %87, %cst_31 {dimension_numbers = #tpu.dot_dimension_numbers<[1], [0], [0], [1], [0, 0, 1, 1], [], []>} : vector<64x120xf32>, vector<120x80xf32>, vector<64x80xf32> -> vector<64x80xf32>
    %89 = arith.addf %79, %88 : vector<64x80xf32>
    %90 = vector.extract_strided_slice %75 {offsets = [1, 0, 0], sizes = [8, 8, 120], strides = [1, 1, 1]} : vector<12x8x120xf32> to vector<8x8x120xf32>
    %91 = vector.shape_cast %90 : vector<8x8x120xf32> to vector<64x120xf32>
    %92 = vector.extract_strided_slice %76 {offsets = [1, 0, 0], sizes = [1, 120, 80], strides = [1, 1, 1]} : vector<5x120x80xf32> to vector<1x120x80xf32>
    %93 = vector.shape_cast %92 : vector<1x120x80xf32> to vector<120x80xf32>
    %cst_32 = arith.constant dense<0.000000e+00> : vector<64x80xf32>
    %94 = tpu.matmul %91, %93, %cst_32 {dimension_numbers = #tpu.dot_dimension_numbers<[1], [0], [0], [1], [0, 0, 1, 1], [], []>} : vector<64x120xf32>, vector<120x80xf32>, vector<64x80xf32> -> vector<64x80xf32>
    %95 = arith.addf %85, %94 : vector<64x80xf32>
    %96 = vector.extract_strided_slice %77 {offsets = [1, 0, 0], sizes = [1, 120, 80], strides = [1, 1, 1]} : vector<5x120x80xf32> to vector<1x120x80xf32>
    %97 = vector.shape_cast %96 : vector<1x120x80xf32> to vector<120x80xf32>
    %cst_33 = arith.constant dense<0.000000e+00> : vector<64x80xf32>
    %98 = tpu.matmul %91, %97, %cst_33 {dimension_numbers = #tpu.dot_dimension_numbers<[1], [0], [0], [1], [0, 0, 1, 1], [], []>} : vector<64x120xf32>, vector<120x80xf32>, vector<64x80xf32> -> vector<64x80xf32>
    %99 = arith.addf %89, %98 : vector<64x80xf32>
    %100 = vector.extract_strided_slice %75 {offsets = [2, 0, 0], sizes = [8, 8, 120], strides = [1, 1, 1]} : vector<12x8x120xf32> to vector<8x8x120xf32>
    %101 = vector.shape_cast %100 : vector<8x8x120xf32> to vector<64x120xf32>
    %102 = vector.extract_strided_slice %76 {offsets = [2, 0, 0], sizes = [1, 120, 80], strides = [1, 1, 1]} : vector<5x120x80xf32> to vector<1x120x80xf32>
    %103 = vector.shape_cast %102 : vector<1x120x80xf32> to vector<120x80xf32>
    %cst_34 = arith.constant dense<0.000000e+00> : vector<64x80xf32>
    %104 = tpu.matmul %101, %103, %cst_34 {dimension_numbers = #tpu.dot_dimension_numbers<[1], [0], [0], [1], [0, 0, 1, 1], [], []>} : vector<64x120xf32>, vector<120x80xf32>, vector<64x80xf32> -> vector<64x80xf32>
    %105 = arith.addf %95, %104 : vector<64x80xf32>
    %106 = vector.extract_strided_slice %77 {offsets = [2, 0, 0], sizes = [1, 120, 80], strides = [1, 1, 1]} : vector<5x120x80xf32> to vector<1x120x80xf32>
    %107 = vector.shape_cast %106 : vector<1x120x80xf32> to vector<120x80xf32>
    %cst_35 = arith.constant dense<0.000000e+00> : vector<64x80xf32>
    %108 = tpu.matmul %101, %107, %cst_35 {dimension_numbers = #tpu.dot_dimension_numbers<[1], [0], [0], [1], [0, 0, 1, 1], [], []>} : vector<64x120xf32>, vector<120x80xf32>, vector<64x80xf32> -> vector<64x80xf32>
    %109 = arith.addf %99, %108 : vector<64x80xf32>
    %110 = vector.extract_strided_slice %75 {offsets = [3, 0, 0], sizes = [8, 8, 120], strides = [1, 1, 1]} : vector<12x8x120xf32> to vector<8x8x120xf32>
    %111 = vector.shape_cast %110 : vector<8x8x120xf32> to vector<64x120xf32>
    %112 = vector.extract_strided_slice %76 {offsets = [3, 0, 0], sizes = [1, 120, 80], strides = [1, 1, 1]} : vector<5x120x80xf32> to vector<1x120x80xf32>
    %113 = vector.shape_cast %112 : vector<1x120x80xf32> to vector<120x80xf32>
    %cst_36 = arith.constant dense<0.000000e+00> : vector<64x80xf32>
    %114 = tpu.matmul %111, %113, %cst_36 {dimension_numbers = #tpu.dot_dimension_numbers<[1], [0], [0], [1], [0, 0, 1, 1], [], []>} : vector<64x120xf32>, vector<120x80xf32>, vector<64x80xf32> -> vector<64x80xf32>
    %115 = arith.addf %105, %114 : vector<64x80xf32>
    %116 = vector.extract_strided_slice %77 {offsets = [3, 0, 0], sizes = [1, 120, 80], strides = [1, 1, 1]} : vector<5x120x80xf32> to vector<1x120x80xf32>
    %117 = vector.shape_cast %116 : vector<1x120x80xf32> to vector<120x80xf32>
    %cst_37 = arith.constant dense<0.000000e+00> : vector<64x80xf32>
    %118 = tpu.matmul %111, %117, %cst_37 {dimension_numbers = #tpu.dot_dimension_numbers<[1], [0], [0], [1], [0, 0, 1, 1], [], []>} : vector<64x120xf32>, vector<120x80xf32>, vector<64x80xf32> -> vector<64x80xf32>
    %119 = arith.addf %109, %118 : vector<64x80xf32>
    %120 = vector.extract_strided_slice %75 {offsets = [4, 0, 0], sizes = [8, 8, 120], strides = [1, 1, 1]} : vector<12x8x120xf32> to vector<8x8x120xf32>
    %121 = vector.shape_cast %120 : vector<8x8x120xf32> to vector<64x120xf32>
    %122 = vector.extract_strided_slice %76 {offsets = [4, 0, 0], sizes = [1, 120, 80], strides = [1, 1, 1]} : vector<5x120x80xf32> to vector<1x120x80xf32>
    %123 = vector.shape_cast %122 : vector<1x120x80xf32> to vector<120x80xf32>
    %cst_38 = arith.constant dense<0.000000e+00> : vector<64x80xf32>
    %124 = tpu.matmul %121, %123, %cst_38 {dimension_numbers = #tpu.dot_dimension_numbers<[1], [0], [0], [1], [0, 0, 1, 1], [], []>} : vector<64x120xf32>, vector<120x80xf32>, vector<64x80xf32> -> vector<64x80xf32>
    %125 = arith.addf %115, %124 : vector<64x80xf32>
    %126 = vector.extract_strided_slice %77 {offsets = [4, 0, 0], sizes = [1, 120, 80], strides = [1, 1, 1]} : vector<5x120x80xf32> to vector<1x120x80xf32>
    %127 = vector.shape_cast %126 : vector<1x120x80xf32> to vector<120x80xf32>
    %cst_39 = arith.constant dense<0.000000e+00> : vector<64x80xf32>
    %128 = tpu.matmul %121, %127, %cst_39 {dimension_numbers = #tpu.dot_dimension_numbers<[1], [0], [0], [1], [0, 0, 1, 1], [], []>} : vector<64x120xf32>, vector<120x80xf32>, vector<64x80xf32> -> vector<64x80xf32>
    %129 = arith.addf %119, %128 : vector<64x80xf32>
    %130 = vector.shape_cast %125 : vector<64x80xf32> to vector<8x8x80xf32>
    %131 = vector.shape_cast %130 : vector<8x8x80xf32> to vector<4x2x8x80xf32>
    %132 = vector.shape_cast %129 : vector<64x80xf32> to vector<8x8x80xf32>
    %133 = vector.shape_cast %132 : vector<8x8x80xf32> to vector<4x2x8x80xf32>
    %134 = vector.extract_strided_slice %131 {offsets = [0, 0, 0, 0], sizes = [4, 1, 8, 80], strides = [1, 1, 1, 1]} : vector<4x2x8x80xf32> to vector<4x1x8x80xf32>
    %135 = vector.shape_cast %134 : vector<4x1x8x80xf32> to vector<4x8x80xf32>
    %136 = vector.extract_strided_slice %131 {offsets = [0, 1, 0, 0], sizes = [4, 1, 8, 80], strides = [1, 1, 1, 1]} : vector<4x2x8x80xf32> to vector<4x1x8x80xf32>
    %137 = vector.shape_cast %136 : vector<4x1x8x80xf32> to vector<4x8x80xf32>
    %138 = arith.maximumf %135, %137 : vector<4x8x80xf32>
    %139 = vector.extract_strided_slice %133 {offsets = [0, 0, 0, 0], sizes = [4, 1, 8, 80], strides = [1, 1, 1, 1]} : vector<4x2x8x80xf32> to vector<4x1x8x80xf32>
    %140 = vector.shape_cast %139 : vector<4x1x8x80xf32> to vector<4x8x80xf32>
    %141 = vector.extract_strided_slice %133 {offsets = [0, 1, 0, 0], sizes = [4, 1, 8, 80], strides = [1, 1, 1, 1]} : vector<4x2x8x80xf32> to vector<4x1x8x80xf32>
    %142 = vector.shape_cast %141 : vector<4x1x8x80xf32> to vector<4x8x80xf32>
    %143 = arith.maximumf %140, %142 : vector<4x8x80xf32>
    %144 = arith.maximumf %138, %143 : vector<4x8x80xf32>
    %c0_40 = arith.constant 0 : index
    %c0_41 = arith.constant 0 : index
    %145 = vector.load %arg7[%c0_40, %c0_41] : memref<1x80xf32, #tpu.memory_space<vmem>>, vector<1x80xf32>
    %146 = vector.shape_cast %145 : vector<1x80xf32> to vector<1x1x80xf32>
    %147 = vector.broadcast %146 : vector<1x1x80xf32> to vector<4x8x80xf32>
    %148 = arith.addf %144, %147 : vector<4x8x80xf32>
    %cst_42 = arith.constant 0.000000e+00 : f32
    %149 = vector.broadcast %cst_42 : f32 to vector<4x8x80xf32>
    %150 = arith.maximumf %148, %149 : vector<4x8x80xf32>
    %c0_43 = arith.constant 0 : index
    %c0_44 = arith.constant 0 : index
    %c0_45 = arith.constant 0 : index
    %151 = vector.load %arg8[%c0_43, %c0_44, %c0_45] : memref<4x80x50xf32, #tpu.memory_space<vmem>>, vector<4x80x50xf32>
    "tpu.trace_start"() <{level = 10 : i32, message = "ubk,ukf->ubf"}> : () -> ()
    %cst_46 = arith.constant dense<0.000000e+00> : vector<4x8x50xf32>
    %152 = tpu.matmul %150, %151, %cst_46 {dimension_numbers = #tpu.dot_dimension_numbers<[2], [1], [1], [2], [0, 0, 0, 1, 1, 2], [0], [0]>} : vector<4x8x80xf32>, vector<4x80x50xf32>, vector<4x8x50xf32> -> vector<4x8x50xf32>
    "tpu.trace_stop"() : () -> ()
    %cst_47 = arith.constant dense<0.000000e+00> : vector<8x50xf32>
    %153 = vector.multi_reduction <add>, %152, %cst_47 [0] : vector<4x8x50xf32> to vector<8x50xf32>
    %c0_48 = arith.constant 0 : index
    %c0_49 = arith.constant 0 : index
    %154 = vector.load %arg9[%c0_48, %c0_49] : memref<1x50xf32, #tpu.memory_space<vmem>>, vector<1x50xf32>
    %155 = vector.broadcast %154 : vector<1x50xf32> to vector<8x50xf32>
    %156 = arith.addf %153, %155 : vector<8x50xf32>
    %cst_50 = arith.constant 0.000000e+00 : f32
    %157 = vector.broadcast %cst_50 : f32 to vector<8x50xf32>
    %158 = arith.maximumf %156, %157 : vector<8x50xf32>
    %c0_51 = arith.constant 0 : index
    %c0_52 = arith.constant 0 : index
    %159 = vector.load %arg10[%c0_51, %c0_52] : memref<50x10xf32, #tpu.memory_space<vmem>>, vector<50x10xf32>
    %cst_53 = arith.constant dense<0.000000e+00> : vector<8x10xf32>
    %160 = tpu.matmul %158, %159, %cst_53 {dimension_numbers = #tpu.dot_dimension_numbers<[1], [0], [0], [1], [0, 0, 1, 1], [], []>} : vector<8x50xf32>, vector<50x10xf32>, vector<8x10xf32> -> vector<8x10xf32>
    %c0_54 = arith.constant 0 : index
    %c0_55 = arith.constant 0 : index
    %161 = vector.load %arg11[%c0_54, %c0_55] : memref<1x10xf32, #tpu.memory_space<vmem>>, vector<1x10xf32>
    %162 = vector.broadcast %161 : vector<1x10xf32> to vector<8x10xf32>
    %163 = arith.addf %160, %162 : vector<8x10xf32>
    %cst_56 = arith.constant dense<0xFF800000> : vector<8xf32>
    %164 = vector.multi_reduction <maximumf>, %163, %cst_56 [1] : vector<8x10xf32> to vector<8xf32>
    %165 = vector.shape_cast %164 : vector<8xf32> to vector<8x1xf32>
    %166 = vector.broadcast %165 : vector<8x1xf32> to vector<8x10xf32>
    %167 = arith.subf %163, %166 : vector<8x10xf32>
    %168 = math.exp %167 : vector<8x10xf32>
    %cst_57 = arith.constant dense<0.000000e+00> : vector<8xf32>
    %169 = vector.multi_reduction <add>, %168, %cst_57 [1] : vector<8x10xf32> to vector<8xf32>
    %170 = vector.shape_cast %169 : vector<8xf32> to vector<8x1xf32>
    %171 = math.log %170 : vector<8x1xf32>
    %172 = vector.broadcast %171 : vector<8x1xf32> to vector<8x10xf32>
    %173 = arith.subf %167, %172 : vector<8x10xf32>
    %c0_58 = arith.constant 0 : index
    %c0_59 = arith.constant 0 : index
    %174 = vector.load %arg12[%c0_58, %c0_59] : memref<8x10xf32, #tpu.memory_space<vmem>>, vector<8x10xf32>
    tpu.vector_store %arg12[%c0_58, %c0_59], %173 {strides = array<i32>} : memref<8x10xf32, #tpu.memory_space<vmem>>, vector<8x10xf32>,
    return
  }
  func.func @transform_0(%arg0: i32) -> (i32, i32, i32) {
    %c0_i32 = arith.constant 0 : i32
    %c0_i32_0 = arith.constant 0 : i32
    %c0_i32_1 = arith.constant 0 : i32
    return %c0_i32, %arg0, %c0_i32_0 : i32, i32, i32
  }
  func.func @transform_1(%arg0: i32) -> (i32, i32, i32) {
    %c0_i32 = arith.constant 0 : i32
    %c0_i32_0 = arith.constant 0 : i32
    %c0_i32_1 = arith.constant 0 : i32
    %c0_i32_2 = arith.constant 0 : i32
    return %c0_i32, %c0_i32_0, %c0_i32_1 : i32, i32, i32
  }
  func.func @transform_2(%arg0: i32) -> (i32, i32, i32) {
    %c0_i32 = arith.constant 0 : i32
    %c0_i32_0 = arith.constant 0 : i32
    %c0_i32_1 = arith.constant 0 : i32
    %c0_i32_2 = arith.constant 0 : i32
    return %c0_i32, %c0_i32_0, %c0_i32_1 : i32, i32, i32
  }
  func.func @transform_3(%arg0: i32) -> (i32, i32) {
    %c0_i32 = arith.constant 0 : i32
    %c0_i32_0 = arith.constant 0 : i32
    %c0_i32_1 = arith.constant 0 : i32
    return %c0_i32, %c0_i32_0 : i32, i32
  }
  func.func @transform_4(%arg0: i32) -> (i32, i32, i32) {
    %c0_i32 = arith.constant 0 : i32
    %c0_i32_0 = arith.constant 0 : i32
    %c0_i32_1 = arith.constant 0 : i32
    %c0_i32_2 = arith.constant 0 : i32
    return %c0_i32, %c0_i32_0, %c0_i32_1 : i32, i32, i32
  }
  func.func @transform_5(%arg0: i32) -> (i32, i32, i32) {
    %c0_i32 = arith.constant 0 : i32
    %c0_i32_0 = arith.constant 0 : i32
    %c0_i32_1 = arith.constant 0 : i32
    %c0_i32_2 = arith.constant 0 : i32
    return %c0_i32, %c0_i32_0, %c0_i32_1 : i32, i32, i32
  }
  func.func @transform_6(%arg0: i32) -> (i32, i32) {
    %c0_i32 = arith.constant 0 : i32
    %c0_i32_0 = arith.constant 0 : i32
    %c0_i32_1 = arith.constant 0 : i32
    return %c0_i32, %c0_i32_0 : i32, i32
  }
  func.func @transform_7(%arg0: i32) -> (i32, i32, i32) {
    %c0_i32 = arith.constant 0 : i32
    %c0_i32_0 = arith.constant 0 : i32
    %c0_i32_1 = arith.constant 0 : i32
    %c0_i32_2 = arith.constant 0 : i32
    return %c0_i32, %c0_i32_0, %c0_i32_1 : i32, i32, i32
  }
  func.func @transform_8(%arg0: i32) -> (i32, i32) {
    %c0_i32 = arith.constant 0 : i32
    %c0_i32_0 = arith.constant 0 : i32
    %c0_i32_1 = arith.constant 0 : i32
    return %c0_i32, %c0_i32_0 : i32, i32
  }
  func.func @transform_9(%arg0: i32) -> (i32, i32) {
    %c0_i32 = arith.constant 0 : i32
    %c0_i32_0 = arith.constant 0 : i32
    %c0_i32_1 = arith.constant 0 : i32
    return %c0_i32, %c0_i32_0 : i32, i32
  }
  func.func @transform_10(%arg0: i32) -> (i32, i32) {
    %c0_i32 = arith.constant 0 : i32
    %c0_i32_0 = arith.constant 0 : i32
    %c0_i32_1 = arith.constant 0 : i32
    return %c0_i32, %c0_i32_0 : i32, i32
  }
  func.func @transform_11(%arg0: i32) -> (i32, i32) {
    %c0_i32 = arith.constant 0 : i32
    %c0_i32_0 = arith.constant 0 : i32
    return %arg0, %c0_i32 : i32, i32
  }
}

</mosaic_0001>

<bundles_post_ra>
// kernel: tile.13
= control target key start
LH: loop header
LB: loop body
LE: loop exit
PB: predicated region body
PF: predicated region fallthrough
CT: control target
= control target key end

     0   :  { %s28_s0 = inlined_call_operand.vmem [shape: f32[10], index: 0, kind: input, shape index: {}]   ;;  %s29_s1 = inlined_call_operand.vmem [shape: f32[12,10], index: 1, kind: output, shape index: {}]  }
   0x1   :  { %v4_v0 = vld [vmem:[%s28_s0] ss:$0 sm:$0xff] }
   0x2   :  { %5 = vst [vmem:[%s29_s1] sm:$0xff] %v4_v0  ;;  %8 = vst [vmem:[%s29_s1 + $0x8] sm:$0xff] %v4_v0 }

// kernel: tile.14
= control target key start
LH: loop header
LB: loop body
LE: loop exit
PB: predicated region body
PF: predicated region fallthrough
CT: control target
= control target key end

     0   :  { %s99_s10 = smov 110   ;;  %s100_s11 = smov 90   ;;  %vm3_vm0 = vcmask 80896   ;;  %vm9_vm1 = vcmask 982896   ;;  %vm15_vm2 = vcmask 900896   ;;  %vm21_vm3 = vcmask 818896   ;;  %s159_s0 = inlined_call_operand.vmem [shape: f32[12,10], index: 0, kind: input, shape index: {}]   ;;  %s160_s1 = inlined_call_operand.vmem [shape: f32[1,120], index: 1, kind: output, shape index: {}]  }
   0x1   :  { %v77_v0 = vld [vmem:[%s159_s0 + $0xb] sm:$0x1]   ;;  %v79_v1 = vld [vmem:[%s159_s0 + $0x9] sm:$0x1]   ;;  %v78_v2 = vld [vmem:[%s159_s0 + $0xa] sm:$0x1]  }
   0x2   :  { %7 = vrot.lane.b32.xlu0 %v77_v0, %s99_s10  ;;  %19 = vrot.lane.b32.xlu1 %v79_v1, %s100_s11  ;;  %v80_v3 = vld [vmem:[%s159_s0 + $0x8] sm:$0x1]   ;;  %s101_s16 = smov 100   ;;  %s102_s17 = smov 80   ;;  %v81_v4 = vld [vmem:[%s159_s0 + $0x7] sm:$0x1]  }
   0x3   :  { %v2_v5 = vld [vmem:[%s159_s0] sm:$0x1]   ;;  %v82_v6 = vld [vmem:[%s159_s0 + $0x6] sm:$0x1]   ;;  %s103_s24 = smov 70   ;;  %s104_s25 = smov 60  }
   0x4   :  { %4 = vst.msk [vmem:[#allocation0] sm:$0x1] %vm3_vm0, %v2_v5   ;;  %v83_v7 = vld [vmem:[%s159_s0 + $0x5] sm:$0x1]   ;;  %v84_v8 = vld [vmem:[%s159_s0 + $0x4] sm:$0x1]  }
   0x5   :  { %s105_s30 = smov 50   ;;  %s106_s2 = smov 40   ;;  %v85_v9 = vld [vmem:[%s159_s0 + $0x3] sm:$0x1]   ;;  %v86_v10 = vld [vmem:[%s159_s0 + $0x2] sm:$0x1]  }
   0x6   :  { %13 = vrot.lane.b32.xlu0 %v78_v2, %s101_s16  ;;  %25 = vrot.lane.b32.xlu1 %v80_v3, %s102_s17  ;;  %s107_s7 = smov 30   ;;  %s108_s8 = smov 20   ;;  %v87_v11 = vld [vmem:[%s159_s0 + $0x1] sm:$0x1]   ;;  %vm27_vm4 = vcmask 736896   ;;  %vm33_vm5 = vcmask 654896  }
   0x7   :  { %s109_s0 = smov 10   ;;  %vm39_vm6 = vcmask 572896   ;;  %vm45_vm7 = vcmask 490896   ;;  %vm51_vm8 = vcmask 408896   ;;  %vm57_vm9 = vcmask 326896  }
   0x8   :  { %vm63_vm10 = vcmask 244896   ;;  %vm69_vm11 = vcmask 162896  }
   0xa   :  { %31 = vrot.lane.b32.xlu0 %v81_v4, %s103_s24  ;;  %37 = vrot.lane.b32.xlu1 %v82_v6, %s104_s25 }
   0xe   :  { %43 = vrot.lane.b32.xlu0 %v83_v7, %s105_s30  ;;  %49 = vrot.lane.b32.xlu1 %v84_v8, %s106_s2 }
  0x12   :  { %55 = vrot.lane.b32.xlu0 %v85_v9, %s107_s7  ;;  %61 = vrot.lane.b32.xlu1 %v86_v10, %s108_s8 }
  0x16   :  { %67 = vrot.lane.b32.xlu0 %v87_v11, %s109_s0 }
  0x74   :  { %v8_v12 = vpop.permute.xlu0 %7   ;;  %v20_v13 = vpop.permute.xlu1 %19  }
  0x75   :  { %10 = vst.msk [vmem:[#allocation0] sm:$0x1] %vm9_vm1, %v8_v12  }
  0x78   :  { %v14_v14 = vpop.permute.xlu0 %13   ;;  %v26_v15 = vpop.permute.xlu1 %25  }
  0x79   :  { %16 = vst.msk [vmem:[#allocation0] sm:$0x1] %vm15_vm2, %v14_v14  }
  0x7a   :  { %22 = vst.msk [vmem:[#allocation0] sm:$0x1] %vm21_vm3, %v20_v13  }
  0x7b   :  { %28 = vst.msk [vmem:[#allocation0] sm:$0x1] %vm27_vm4, %v26_v15  }
  0x7c   :  { %v32_v16 = vpop.permute.xlu0 %31   ;;  %v38_v17 = vpop.permute.xlu1 %37  }
  0x7d   :  { %34 = vst.msk [vmem:[#allocation0] sm:$0x1] %vm33_vm5, %v32_v16  }
  0x7e   :  { %40 = vst.msk [vmem:[#allocation0] sm:$0x1] %vm39_vm6, %v38_v17  }
  0x80   :  { %v44_v18 = vpop.permute.xlu0 %43   ;;  %v50_v19 = vpop.permute.xlu1 %49  }
  0x81   :  { %46 = vst.msk [vmem:[#allocation0] sm:$0x1] %vm45_vm7, %v44_v18  }
  0x82   :  { %52 = vst.msk [vmem:[#allocation0] sm:$0x1] %vm51_vm8, %v50_v19  }
  0x84   :  { %v56_v20 = vpop.permute.xlu0 %55   ;;  %v62_v21 = vpop.permute.xlu1 %61  }
  0x85   :  { %58 = vst.msk [vmem:[#allocation0] sm:$0x1] %vm57_vm9, %v56_v20  }
  0x86   :  { %64 = vst.msk [vmem:[#allocation0] sm:$0x1] %vm63_vm10, %v62_v21  }
  0x88   :  { %v68_v22 = vpop.permute.xlu0 %67  }
  0x89   :  { %70 = vst.msk [vmem:[#allocation0] sm:$0x1] %vm69_vm11, %v68_v22  }
  0x90   :  { %v74_v23 = vld [vmem:[#allocation0] sm:$0x1] }
  0x91   :  { %76 = vst [vmem:[%s160_s1] sm:$0x1] %v74_v23 }

// kernel: tile.18
= control target key start
LH: loop header
LB: loop body
LE: loop exit
PB: predicated region body
PF: predicated region fallthrough
CT: control target
= control target key end

     0   :  { %s22_s0 = inlined_call_operand.vmem [shape: f32[20], index: 0, kind: input, shape index: {}]   ;;  %s23_s1 = inlined_call_operand.vmem [shape: f32[4,20], index: 1, kind: output, shape index: {}]  }
   0x1   :  { %v4_v0 = vld [vmem:[%s22_s0] ss:$0 sm:$0xff] }
   0x2   :  { %5 = vst [vmem:[%s23_s1] sm:$0xf] %v4_v0 }

// kernel: tile.19
= control target key start
LH: loop header
LB: loop body
LE: loop exit
PB: predicated region body
PF: predicated region fallthrough
CT: control target
= control target key end

     0   :  { %vm7_vm0 = vcmask 162816   ;;  %s37_s8 = smov 20   ;;  %s38_s9 = smov 40   ;;  %vm13_vm1 = vcmask 654816   ;;  %vm19_vm2 = vcmask 490816   ;;  %vm25_vm3 = vcmask 326816   ;;  %s55_s0 = inlined_call_operand.vmem [shape: f32[4,20], index: 0, kind: input, shape index: {}]   ;;  %s56_s1 = inlined_call_operand.vmem [shape: f32[1,80], index: 1, kind: output, shape index: {}]  }
   0x1   :  { %v4_v0 = vld [vmem:[%s55_s0] sm:$0xf]  ;;  %s36_s0 = smov 60  }
   0x2   :  { %5 = vst [vmem:[#allocation1] sm:$0xf] %v4_v0 }
   0x9   :  { %v10_v1 = vld [vmem:[#allocation1 + $0x3] sm:$0x1]   ;;  %v22_v2 = vld [vmem:[#allocation1 + $0x1] sm:$0x1]   ;;  %v6_v3 = vld [vmem:[#allocation1] sm:$0x1]  }
   0xa   :  { %11 = vrot.lane.b32.xlu0 %v10_v1, %s36_s0  ;;  %23 = vrot.lane.b32.xlu1 %v22_v2, %s37_s8  ;;  %v16_v4 = vld [vmem:[#allocation1 + $0x2] sm:$0x1]   ;;  %8 = vst.msk [vmem:[#allocation0] sm:$0x1] %vm7_vm0, %v6_v3  }
   0xe   :  { %17 = vrot.lane.b32.xlu0 %v16_v4, %s38_s9 }
  0x7c   :  { %v12_v5 = vpop.permute.xlu0 %11   ;;  %v24_v6 = vpop.permute.xlu1 %23  }
  0x7d   :  { %14 = vst.msk [vmem:[#allocation0] sm:$0x1] %vm13_vm1, %v12_v5  }
  0x80   :  { %v18_v7 = vpop.permute.xlu0 %17  }
  0x81   :  { %20 = vst.msk [vmem:[#allocation0] sm:$0x1] %vm19_vm2, %v18_v7  }
  0x82   :  { %26 = vst.msk [vmem:[#allocation0] sm:$0x1] %vm25_vm3, %v24_v6  }
  0x89   :  { %v30_v8 = vld [vmem:[#allocation0] sm:$0x1] }
  0x8a   :  { %32 = vst [vmem:[%s56_s1] sm:$0x1] %v30_v8 }

// kernel: xla_mnist_forward.1
= control target key start
LH: loop header
LB: loop body
LE: loop exit
PB: predicated region body
PF: predicated region fallthrough
CT: control target
= control target key end

     0   :  { %vm179_vm0 = vcmask 1043456   ;;  %vm6638_vm1 = vmmov 1   ;;  %vm106_vm3 = vcmask 228352   ;;  %vm2433_vm4 = vcmask 982016   ;;  %s8362_s1 = inlined_call_operand.vmem [shape: f32[5,28,120], index: 1, kind: input, shape index: {}]   ;;  %s8363_s2 = inlined_call_operand.vmem [shape: f32[5,28,120], index: 2, kind: input, shape index: {}]   ;;  %s8364_s0 = inlined_call_operand.vmem [shape: f32[28,8,28], index: 0, kind: input, shape index: {}]   ;;  %s8365_s4 = inlined_call_operand.vmem [shape: f32[5,120,80], index: 4, kind: input, shape index: {}]   ;;  %s8366_s5 = inlined_call_operand.vmem [shape: f32[5,120,80], index: 5, kind: input, shape index: {}]   ;;  %s8367_s3 = inlined_call_operand.vmem [shape: f32[1,120], index: 3, kind: input, shape index: {}]   ;;  %s8368_s7 = inlined_call_operand.vmem [shape: f32[4,80,50], index: 7, kind: input, shape index: {}]   ;;  %s8369_s6 = inlined_call_operand.vmem [shape: f32[1,80], index: 6, kind: input, shape index: {}]   ;;  %s8370_s9 = inlined_call_operand.vmem [shape: f32[50,10], index: 9, kind: input, shape index: {}]   ;;  %s8371_s8 = inlined_call_operand.vmem [shape: f32[1,50], index: 8, kind: input, shape index: {}]   ;;  %s8372_s10 = inlined_call_operand.vmem [shape: f32[1,10], index: 10, kind: input, shape index: {}]   ;;  %s8373_s11 = inlined_call_operand.vmem [shape: f32[8,10], index: 11, kind: output, shape index: {}]  }
   0x1   :  { %v70_v0 = vld [vmem:[%s8362_s1 + $0x20] sm:$0xff]  ;;  %v71_v1 = vld [vmem:[%s8362_s1 + $0x28] sm:$0xff]  ;;  %v72_v5 = vld [vmem:[%s8362_s1 + $0x30] sm:$0xff]  ;;  %vm6640_vm5 = vmmov 0   ;;  %vm3635_vm6 = vcmask 654336   ;;  %vm3962_vm7 = vcmask 1041408  }
   0x2   :  { %v90_v2 = vld [vmem:[%s8363_s2 + $0x20] sm:$0xff]  ;;  %v5925_v3 = vpack.c.bf16 %v71_v1, %v70_v0  ;;  %v91_v4 = vld [vmem:[%s8363_s2 + $0x28] sm:$0xff]  ;;  %v73_v6 = vld [vmem:[%s8362_s1 + $0x38] sm:$0xf]  ;;  %vm3928_vm8 = vcmask 408576   ;;  %vm4036_vm9 = vcmask 80896  }
   0x3   :  { %v5945_v7 = vpack.c.bf16 %v91_v4, %v90_v2  ;;  %v5929_v8 = vpack.c.bf16 %v73_v6, %v72_v5  ;;  %vm6720_vm2 = vmpackc.low %vm179_vm0, %vm6638_vm1  ;;  %v92_v10 = vld [vmem:[%s8363_s2 + $0x30] sm:$0xff]  ;;  %v93_v11 = vld [vmem:[%s8363_s2 + $0x38] sm:$0xf] }
   0x4   :  { %5926 = vmatprep.subr.bf16.mxu0 %v5925_v3  ;;  %v5949_v12 = vpack.c.bf16 %v93_v11, %v92_v10  ;;  %v6733_v13 = vld [vmem:[%s8364_s0 + $0x8] sm:$0xff]  ;;  %v66_v14 = vld [vmem:[%s8362_s1] sm:$0xff]  ;;  %v6760_v20 = vld [vmem:[%s8364_s0 + $0x10] sm:$0xff] }
   0x5   :  { %5946 = vmatprep.subr.bf16.mxu1 %v5945_v7  ;;  %5928 = vmatpush3.bf16.msra.mxu0 %v5925_v3  ;;  %v67_v15 = vld [vmem:[%s8362_s1 + $0x8] sm:$0xff]  ;;  %v86_v16 = vld [vmem:[%s8363_s2] sm:$0xff]  ;;  %v68_v21 = vld [vmem:[%s8362_s1 + $0x10] sm:$0xff] }
   0x6   :  { %v87_v17 = vld [vmem:[%s8363_s2 + $0x8] sm:$0xff]  ;;  %5948 = vmatpush3.bf16.msra.mxu1 %v5945_v7  ;;  %5931 = vmatprep.subr.msk.bf16.mxu0 %vm6720_vm2, %v5929_v8  ;;  %v5935_v18 = vpack.c.bf16 %v67_v15, %v66_v14  ;;  %v69_v22 = vld [vmem:[%s8362_s1 + $0x18] sm:$0xf]  ;;  %v88_v23 = vld [vmem:[%s8363_s2 + $0x10] sm:$0xff] }
   0x7   :  { %5951 = vmatprep.subr.msk.bf16.mxu1 %vm6720_vm2, %v5949_v12  ;;  %4964 = vmatprep.mubr.msk.f32.mxu0 %vm106_vm3, %v6733_v13  ;;  %v5955_v19 = vpack.c.bf16 %v87_v17, %v86_v16  ;;  %v6776_v24 = vld [vmem:[%s8364_s0 + $0x18] sm:$0xff]  ;;  %v5939_v25 = vpack.c.bf16 %v69_v22, %v68_v21  ;;  %v6788_v28 = vld [vmem:[%s8364_s0 + $0x20] sm:$0xff]  ;;  %v6795_v29 = vld [vmem:[%s8364_s0 + $0x28] sm:$0xff] }
   0x8   :  { %5052 = vmatprep.mubr.msk.f32.mxu1 %vm106_vm3, %v6733_v13  ;;  %v89_v26 = vld [vmem:[%s8363_s2 + $0x18] sm:$0xf]  ;;  %v74_v30 = vld [vmem:[%s8362_s1 + $0x40] sm:$0xff]  ;;  %v75_v31 = vld [vmem:[%s8362_s1 + $0x48] sm:$0xff] }
   0x9   :  { %5934 = vmatpush3.bf16.msk.msra.mxu0 %vm6720_vm2, %v5929_v8  ;;  %v5959_v27 = vpack.c.bf16 %v89_v26, %v88_v23  ;;  %v94_v32 = vld [vmem:[%s8363_s2 + $0x40] sm:$0xff]  ;;  %v6814_v33 = vpack.c.bf16 %v75_v31, %v74_v30  ;;  %v95_v34 = vld [vmem:[%s8363_s2 + $0x48] sm:$0xff]  ;;  %v6826_v35 = vld [vmem:[%s8364_s0 + $0x30] sm:$0xff] }
   0xa   :  { %5954 = vmatpush3.bf16.msk.msra.mxu1 %vm6720_vm2, %v5949_v12  ;;  %5936 = vmatprep.subr.bf16.mxu0 %v5935_v18  ;;  %v6828_v36 = vpack.c.bf16 %v95_v34, %v94_v32  ;;  %v6835_v37 = vld [vmem:[%s8364_s0 + $0x38] sm:$0xff]  ;;  %v6852_v38 = vld [vmem:[%s8364_s0 + $0x40] sm:$0xff]  ;;  %v6859_v39 = vld [vmem:[%s8364_s0 + $0x48] sm:$0xff] }
   0xb   :  { %5956 = vmatprep.subr.bf16.mxu1 %v5955_v19  ;;  %v6870_v40 = vld [vmem:[%s8364_s0 + $0x50] sm:$0xff]  ;;  %v6877_v41 = vld [vmem:[%s8364_s0 + $0x58] sm:$0xff]  ;;  %v6888_v42 = vld [vmem:[%s8364_s0 + $0x60] sm:$0xff] }
   0xc   :  { %4965 = vmatmul.mubr.msk.f32.vlgmr.msra.gmra.mrb[0].mxu0 %vm106_vm3, %v6760_v20  ;;  %v6895_v43 = vld [vmem:[%s8364_s0 + $0x68] sm:$0xff]  ;;  %v6906_v44 = vld [vmem:[%s8364_s0 + $0x70] sm:$0xff]  ;;  %v6913_v45 = vld [vmem:[%s8364_s0 + $0x78] sm:$0xff] }
   0xd   :  { %5053 = vmatmul.mubr.msk.f32.vlgmr.msra.gmra.mrb[0].mxu1 %vm106_vm3, %v6760_v20  ;;  %5938 = vmatpush3.bf16.msra.mxu0 %v5935_v18  ;;  %v6924_v46 = vld [vmem:[%s8364_s0 + $0x80] sm:$0xff]  ;;  %v6931_v47 = vld [vmem:[%s8364_s0 + $0x88] sm:$0xff]  ;;  %v6942_v48 = vld [vmem:[%s8364_s0 + $0x90] sm:$0xff] }
   0xe   :  { %5958 = vmatpush3.bf16.msra.mxu1 %v5955_v19  ;;  %4967 = vmatprep.mubr.msk.f32.mxu0 %vm106_vm3, %v6776_v24  ;;  %v6949_v49 = vld [vmem:[%s8364_s0 + $0x98] sm:$0xff]  ;;  %v6960_v50 = vld [vmem:[%s8364_s0 + $0xa0] sm:$0xff]  ;;  %v6967_v51 = vld [vmem:[%s8364_s0 + $0xa8] sm:$0xff] }
   0xf   :  { %5055 = vmatprep.mubr.msk.f32.mxu1 %vm106_vm3, %v6776_v24  ;;  %5941 = vmatprep.subr.msk.bf16.mxu0 %vm6720_vm2, %v5939_v25  ;;  %v6978_v52 = vld [vmem:[%s8364_s0 + $0xb0] sm:$0xff]  ;;  %v6985_v53 = vld [vmem:[%s8364_s0 + $0xb8] sm:$0xff]  ;;  %v6996_v54 = vld [vmem:[%s8364_s0 + $0xc0] sm:$0xff] }
  0x10   :  { %4968 = vmatmul.mubr.msk.f32.gmra.mrb[2].mxu0 %vm106_vm3, %v6788_v28  ;;  %5961 = vmatprep.subr.msk.bf16.mxu1 %vm6720_vm2, %v5959_v27  ;;  %v38_v55 = vld [vmem:[%s8364_s0] sm:$0xff]  ;;  %v76_v56 = vld [vmem:[%s8362_s1 + $0x50] sm:$0xff]  ;;  %v77_v57 = vld [vmem:[%s8362_s1 + $0x58] sm:$0xf] }
  0x11   :  { %5056 = vmatmul.mubr.msk.f32.gmra.mrb[2].mxu1 %vm106_vm3, %v6788_v28  ;;  %4970 = vmatprep.mubr.msk.f32.mxu0 %vm106_vm3, %v6795_v29  ;;  %v96_v58 = vld [vmem:[%s8363_s2 + $0x50] sm:$0xff]  ;;  %v97_v59 = vld [vmem:[%s8363_s2 + $0x58] sm:$0xf]  ;;  %v5969_v60 = vpack.c.bf16 %v77_v57, %v76_v56  ;;  %v78_v62 = vld [vmem:[%s8362_s1 + $0x60] sm:$0xff] }
  0x12   :  { %5058 = vmatprep.mubr.msk.f32.mxu1 %vm106_vm3, %v6795_v29  ;;  %5944 = vmatpush3.bf16.msk.msra.mxu0 %vm6720_vm2, %v5939_v25  ;;  %v5979_v61 = vpack.c.bf16 %v97_v59, %v96_v58  ;;  %v79_v63 = vld [vmem:[%s8362_s1 + $0x68] sm:$0xff]  ;;  %v98_v0 = vld [vmem:[%s8363_s2 + $0x60] sm:$0xff]  ;;  %v80_v4 = vld [vmem:[%s8362_s1 + $0x70] sm:$0xff] }
  0x13   :  { %5964 = vmatpush3.bf16.msk.msra.mxu1 %vm6720_vm2, %v5959_v27  ;;  %5966 = vmatprep.subr.bf16.mxu0 %v6814_v33  ;;  %v99_v1 = vld [vmem:[%s8363_s2 + $0x68] sm:$0xff]  ;;  %v5985_v2 = vpack.c.bf16 %v79_v63, %v78_v62  ;;  %v81_v5 = vld [vmem:[%s8362_s1 + $0x78] sm:$0xf]  ;;  %v100_v6 = vld [vmem:[%s8363_s2 + $0x70] sm:$0xff] }
  0x14   :  { %4971 = vmatmul.mubr.msk.f32.gmra.mrb[4].mxu0 %vm106_vm3, %v6826_v35  ;;  %5976 = vmatprep.subr.bf16.mxu1 %v6828_v36  ;;  %v5995_v3 = vpack.c.bf16 %v99_v1, %v98_v0  ;;  %v101_v7 = vld [vmem:[%s8363_s2 + $0x78] sm:$0xf]  ;;  %v5989_v8 = vpack.c.bf16 %v81_v5, %v80_v4  ;;  %v82_v11 = vld [vmem:[%s8362_s1 + $0x80] sm:$0xff]  ;;  %v83_v12 = vld [vmem:[%s8362_s1 + $0x88] sm:$0xff] }
  0x15   :  { %5059 = vmatmul.mubr.msk.f32.gmra.mrb[4].mxu1 %vm106_vm3, %v6826_v35  ;;  %4973 = vmatprep.mubr.msk.f32.mxu0 %vm106_vm3, %v6835_v37  ;;  %v5999_v10 = vpack.c.bf16 %v101_v7, %v100_v6  ;;  %v103_v14 = vld [vmem:[%s8363_s2 + $0x88] sm:$0xff]  ;;  %v7173_v15 = vpack.c.bf16 %v83_v12, %v82_v11  ;;  %v84_v18 = vld [vmem:[%s8362_s1 + $0x90] sm:$0xff]  ;;  %v85_v19 = vld [vmem:[%s8362_s1 + $0x98] sm:$0xf] }
  0x16   :  { %5061 = vmatprep.mubr.msk.f32.mxu1 %vm106_vm3, %v6835_v37  ;;  %v7266_v17 = vld [vmem:[%s8364_s0 + $0xc8] sm:$0xff]  ;;  %v105_v21 = vld [vmem:[%s8363_s2 + $0x98] sm:$0xf]  ;;  %v6009_v22 = vpack.c.bf16 %v85_v19, %v84_v18  ;;  %v2299_v26 = vld [vmem:[%s8365_s4 + $0x80] sm:$0xff] }
  0x17   :  { %v2298_v25 = vld [vmem:[%s8365_s4 + $0x78] sm:$0xff]  ;;  %v2374_v27 = vld [vmem:[%s8366_s5 + $0x80] sm:$0xff]  ;;  %v7407_v9 = vld [vmem:[%s8364_s0 + $0xd0] sm:$0xff] }
  0x18   :  { %4974 = vmatmul.mubr.msk.f32.gmra.mrb[6].mxu0 %vm106_vm3, %v6852_v38  ;;  %v7314_v30 = vpack.c.bf16 %v2299_v26, %v2298_v25  ;;  %v2300_v32 = vld [vmem:[%s8365_s4 + $0x88] sm:$0xff]  ;;  %v2302_v57 = vld [vmem:[%s8365_s4 + $0x98] sm:$0xff]  ;;  %v2303_v58 = vld [vmem:[%s8365_s4 + $0xa0] sm:$0xff] }
  0x19   :  { %5062 = vmatmul.mubr.msk.f32.gmra.mrb[6].mxu1 %vm106_vm3, %v6852_v38  ;;  %4976 = vmatprep.mubr.msk.f32.mxu0 %vm106_vm3, %v6859_v39  ;;  %v2375_v34 = vld [vmem:[%s8366_s5 + $0x88] sm:$0xff]  ;;  %v2378_v59 = vld [vmem:[%s8366_s5 + $0xa0] sm:$0xff]  ;;  %v2305_v62 = vld [vmem:[%s8365_s4 + $0xb0] sm:$0xff] }
  0x1a   :  { %5064 = vmatprep.mubr.msk.f32.mxu1 %vm106_vm3, %v6859_v39  ;;  %v2380_v63 = vld [vmem:[%s8366_s5 + $0xb0] sm:$0xff]  ;;  %v2306_v1 = vld [vmem:[%s8365_s4 + $0xb8] sm:$0xff]  ;;  %v2283_v5 = vld [vmem:[%s8365_s4] sm:$0xff] }
  0x1b   :  { %v2284_v6 = vld [vmem:[%s8365_s4 + $0x8] sm:$0xff]  ;;  %v2358_v7 = vld [vmem:[%s8366_s5] sm:$0xff] }
  0x1c   :  { %4977 = vmatmul.mubr.msk.f32.gmra.mrb[8].mxu0 %vm106_vm3, %v6870_v40 }
  0x1d   :  { %5065 = vmatmul.mubr.msk.f32.gmra.mrb[8].mxu1 %vm106_vm3, %v6870_v40  ;;  %4979 = vmatprep.mubr.msk.f32.mxu0 %vm106_vm3, %v6877_v41 }
  0x1e   :  { %5067 = vmatprep.mubr.msk.f32.mxu1 %vm106_vm3, %v6877_v41 }
  0x20   :  { %4980 = vmatmul.mubr.msk.f32.gmra.mrb[10].mxu0 %vm106_vm3, %v6888_v42 }
  0x21   :  { %5068 = vmatmul.mubr.msk.f32.gmra.mrb[10].mxu1 %vm106_vm3, %v6888_v42  ;;  %4982 = vmatprep.mubr.msk.f32.mxu0 %vm106_vm3, %v6895_v43 }
  0x22   :  { %5070 = vmatprep.mubr.msk.f32.mxu1 %vm106_vm3, %v6895_v43 }
  0x24   :  { %4983 = vmatmul.mubr.msk.f32.gmra.mrb[12].mxu0 %vm106_vm3, %v6906_v44 }
  0x25   :  { %5071 = vmatmul.mubr.msk.f32.gmra.mrb[12].mxu1 %vm106_vm3, %v6906_v44  ;;  %4985 = vmatprep.mubr.msk.f32.mxu0 %vm106_vm3, %v6913_v45 }
  0x26   :  { %5073 = vmatprep.mubr.msk.f32.mxu1 %vm106_vm3, %v6913_v45 }
  0x28   :  { %4986 = vmatmul.mubr.msk.f32.gmra.mrb[14].mxu0 %vm106_vm3, %v6924_v46 }
  0x29   :  { %5074 = vmatmul.mubr.msk.f32.gmra.mrb[14].mxu1 %vm106_vm3, %v6924_v46  ;;  %4988 = vmatprep.mubr.msk.f32.mxu0 %vm106_vm3, %v6931_v47 }
  0x2a   :  { %5076 = vmatprep.mubr.msk.f32.mxu1 %vm106_vm3, %v6931_v47 }
  0x2c   :  { %4989 = vmatmul.mubr.msk.f32.gmra.mrb[16].mxu0 %vm106_vm3, %v6942_v48 }
  0x2d   :  { %5077 = vmatmul.mubr.msk.f32.gmra.mrb[16].mxu1 %vm106_vm3, %v6942_v48  ;;  %4991 = vmatprep.mubr.msk.f32.mxu0 %vm106_vm3, %v6949_v49 }
  0x2e   :  { %5079 = vmatprep.mubr.msk.f32.mxu1 %vm106_vm3, %v6949_v49 }
  0x30   :  { %4992 = vmatmul.mubr.msk.f32.gmra.mrb[18].mxu0 %vm106_vm3, %v6960_v50 }
  0x31   :  { %5080 = vmatmul.mubr.msk.f32.gmra.mrb[18].mxu1 %vm106_vm3, %v6960_v50  ;;  %4994 = vmatprep.mubr.msk.f32.mxu0 %vm106_vm3, %v6967_v51 }
  0x32   :  { %5082 = vmatprep.mubr.msk.f32.mxu1 %vm106_vm3, %v6967_v51 }
  0x34   :  { %4995 = vmatmul.mubr.msk.f32.gmra.mrb[20].mxu0 %vm106_vm3, %v6978_v52 }
  0x35   :  { %5083 = vmatmul.mubr.msk.f32.gmra.mrb[20].mxu1 %vm106_vm3, %v6978_v52  ;;  %4997 = vmatprep.mubr.msk.f32.mxu0 %vm106_vm3, %v6985_v53 }
  0x36   :  { %5085 = vmatprep.mubr.msk.f32.mxu1 %vm106_vm3, %v6985_v53 }
  0x38   :  { %4998 = vmatmul.mubr.msk.f32.gmra.mrb[22].mxu0 %vm106_vm3, %v6996_v54 }
  0x39   :  { %5086 = vmatmul.mubr.msk.f32.gmra.mrb[22].mxu1 %vm106_vm3, %v6996_v54  ;;  %5008 = vmatprep.mubr.msk.f32.mxu0 %vm106_vm3, %v38_v55 }
  0x3a   :  { %5096 = vmatprep.mubr.msk.f32.mxu1 %vm106_vm3, %v38_v55 }
  0x3c   :  { %5009 = vmatmul.mubr.msk.f32.vlgmr.msra.gmra.mrb[0].mxu0 %vm106_vm3, %v6733_v13 }
  0x3d   :  { %5097 = vmatmul.mubr.msk.f32.vlgmr.msra.gmra.mrb[0].mxu1 %vm106_vm3, %v6733_v13  ;;  %5968 = vmatpush3.bf16.msra.mxu0 %v6814_v33  ;;  %v102_v13 = vld [vmem:[%s8363_s2 + $0x80] sm:$0xff]  ;;  %v2301_v33 = vld [vmem:[%s8365_s4 + $0x90] sm:$0xff] }
  0x3e   :  { %5978 = vmatpush3.bf16.msra.mxu1 %v6828_v36  ;;  %5011 = vmatprep.mubr.msk.f32.mxu0 %vm106_vm3, %v6760_v20  ;;  %v7179_v16 = vpack.c.bf16 %v103_v14, %v102_v13  ;;  %v2376_v36 = vld [vmem:[%s8366_s5 + $0x90] sm:$0xff]  ;;  %v6029_v55 = vpack.c.bf16 %v2301_v33, %v2300_v32 }
  0x3f   :  { %5099 = vmatprep.mubr.msk.f32.mxu1 %vm106_vm3, %v6760_v20  ;;  %5971 = vmatprep.subr.msk.bf16.mxu0 %vm6720_vm2, %v5969_v60  ;;  %v6085_v56 = vpack.c.bf16 %v2376_v36, %v2375_v34 }
  0x40   :  { %5012 = vmatmul.mubr.msk.f32.gmra.mrb[2].mxu0 %vm106_vm3, %v6776_v24  ;;  %5981 = vmatprep.subr.msk.bf16.mxu1 %vm6720_vm2, %v5979_v61 }
  0x41   :  { %5100 = vmatmul.mubr.msk.f32.gmra.mrb[2].mxu1 %vm106_vm3, %v6776_v24  ;;  %5014 = vmatprep.mubr.msk.f32.mxu0 %vm106_vm3, %v6788_v28 }
  0x42   :  { %5102 = vmatprep.mubr.msk.f32.mxu1 %vm106_vm3, %v6788_v28  ;;  %5974 = vmatpush3.bf16.msk.msra.mxu0 %vm6720_vm2, %v5969_v60 }
  0x43   :  { %5984 = vmatpush3.bf16.msk.msra.mxu1 %vm6720_vm2, %v5979_v61  ;;  %5986 = vmatprep.subr.bf16.mxu0 %v5985_v2  ;;  %v2304_v61 = vld [vmem:[%s8365_s4 + $0xa8] sm:$0xff] }
  0x44   :  { %5015 = vmatmul.mubr.msk.f32.gmra.mrb[4].mxu0 %vm106_vm3, %v6795_v29  ;;  %5996 = vmatprep.subr.bf16.mxu1 %v5995_v3  ;;  %v6037_v0 = vpack.c.bf16 %v2305_v62, %v2304_v61  ;;  %v2360_v61 = vld [vmem:[%s8366_s5 + $0x10] sm:$0xff]  ;;  %v2361_v62 = vld [vmem:[%s8366_s5 + $0x18] sm:$0xff] }
  0x45   :  { %5103 = vmatmul.mubr.msk.f32.gmra.mrb[4].mxu1 %vm106_vm3, %v6795_v29  ;;  %5017 = vmatprep.mubr.msk.f32.mxu0 %vm106_vm3, %v6826_v35 }
  0x46   :  { %5105 = vmatprep.mubr.msk.f32.mxu1 %vm106_vm3, %v6826_v35 }
  0x48   :  { %5018 = vmatmul.mubr.msk.f32.gmra.mrb[6].mxu0 %vm106_vm3, %v6835_v37 }
  0x49   :  { %5106 = vmatmul.mubr.msk.f32.gmra.mrb[6].mxu1 %vm106_vm3, %v6835_v37  ;;  %5020 = vmatprep.mubr.msk.f32.mxu0 %vm106_vm3, %v6852_v38 }
  0x4a   :  { %5108 = vmatprep.mubr.msk.f32.mxu1 %vm106_vm3, %v6852_v38 }
  0x4c   :  { %5021 = vmatmul.mubr.msk.f32.gmra.mrb[8].mxu0 %vm106_vm3, %v6859_v39 }
  0x4d   :  { %5109 = vmatmul.mubr.msk.f32.gmra.mrb[8].mxu1 %vm106_vm3, %v6859_v39  ;;  %5023 = vmatprep.mubr.msk.f32.mxu0 %vm106_vm3, %v6870_v40 }
  0x4e   :  { %5111 = vmatprep.mubr.msk.f32.mxu1 %vm106_vm3, %v6870_v40 }
  0x50   :  { %5024 = vmatmul.mubr.msk.f32.gmra.mrb[10].mxu0 %vm106_vm3, %v6877_v41 }
  0x51   :  { %5112 = vmatmul.mubr.msk.f32.gmra.mrb[10].mxu1 %vm106_vm3, %v6877_v41  ;;  %5026 = vmatprep.mubr.msk.f32.mxu0 %vm106_vm3, %v6888_v42 }
  0x52   :  { %5114 = vmatprep.mubr.msk.f32.mxu1 %vm106_vm3, %v6888_v42 }
  0x54   :  { %5027 = vmatmul.mubr.msk.f32.gmra.mrb[12].mxu0 %vm106_vm3, %v6895_v43 }
  0x55   :  { %5115 = vmatmul.mubr.msk.f32.gmra.mrb[12].mxu1 %vm106_vm3, %v6895_v43  ;;  %5029 = vmatprep.mubr.msk.f32.mxu0 %vm106_vm3, %v6906_v44 }
  0x56   :  { %5117 = vmatprep.mubr.msk.f32.mxu1 %vm106_vm3, %v6906_v44 }
  0x58   :  { %5030 = vmatmul.mubr.msk.f32.gmra.mrb[14].mxu0 %vm106_vm3, %v6913_v45 }
  0x59   :  { %5118 = vmatmul.mubr.msk.f32.gmra.mrb[14].mxu1 %vm106_vm3, %v6913_v45  ;;  %5032 = vmatprep.mubr.msk.f32.mxu0 %vm106_vm3, %v6924_v46 }
  0x5a   :  { %5120 = vmatprep.mubr.msk.f32.mxu1 %vm106_vm3, %v6924_v46 }
  0x5c   :  { %5033 = vmatmul.mubr.msk.f32.gmra.mrb[16].mxu0 %vm106_vm3, %v6931_v47 }
  0x5d   :  { %5121 = vmatmul.mubr.msk.f32.gmra.mrb[16].mxu1 %vm106_vm3, %v6931_v47  ;;  %5035 = vmatprep.mubr.msk.f32.mxu0 %vm106_vm3, %v6942_v48 }
  0x5e   :  { %5123 = vmatprep.mubr.msk.f32.mxu1 %vm106_vm3, %v6942_v48 }
  0x60   :  { %5036 = vmatmul.mubr.msk.f32.gmra.mrb[18].mxu0 %vm106_vm3, %v6949_v49 }
  0x61   :  { %5124 = vmatmul.mubr.msk.f32.gmra.mrb[18].mxu1 %vm106_vm3, %v6949_v49  ;;  %5038 = vmatprep.mubr.msk.f32.mxu0 %vm106_vm3, %v6960_v50 }
  0x62   :  { %5126 = vmatprep.mubr.msk.f32.mxu1 %vm106_vm3, %v6960_v50 }
  0x64   :  { %5039 = vmatmul.mubr.msk.f32.gmra.mrb[20].mxu0 %vm106_vm3, %v6967_v51 }
  0x65   :  { %5127 = vmatmul.mubr.msk.f32.gmra.mrb[20].mxu1 %vm106_vm3, %v6967_v51  ;;  %5041 = vmatprep.mubr.msk.f32.mxu0 %vm106_vm3, %v6978_v52 }
  0x66   :  { %5129 = vmatprep.mubr.msk.f32.mxu1 %vm106_vm3, %v6978_v52 }
  0x68   :  { %5042 = vmatmul.mubr.msk.f32.gmra.mrb[22].mxu0 %vm106_vm3, %v6985_v53 }
  0x69   :  { %5130 = vmatmul.mubr.msk.f32.gmra.mrb[22].mxu1 %vm106_vm3, %v6985_v53  ;;  %5140 = vmatprep.mubr.msk.f32.mxu0 %vm106_vm3, %v6760_v20 }
  0x6a   :  { %5184 = vmatprep.mubr.msk.f32.mxu1 %vm106_vm3, %v6760_v20  ;;  %v104_v20 = vld [vmem:[%s8363_s2 + $0x90] sm:$0xff] }
  0x6b   :  { %v6019_v23 = vpack.c.bf16 %v105_v21, %v104_v20 }
  0x6c   :  { %5141 = vmatmul.mubr.msk.f32.vlgmr.msra.gmra.mrb[0].mxu0 %vm106_vm3, %v6776_v24 }
  0x6d   :  { %5185 = vmatmul.mubr.msk.f32.vlgmr.msra.gmra.mrb[0].mxu1 %vm106_vm3, %v6776_v24  ;;  %5988 = vmatpush3.bf16.msra.mxu0 %v5985_v2  ;;  %v2307_v2 = vld [vmem:[%s8365_s4 + $0xc0] sm:$0xff] }
  0x6e   :  { %5998 = vmatpush3.bf16.msra.mxu1 %v5995_v3  ;;  %5143 = vmatprep.mubr.msk.f32.mxu0 %vm106_vm3, %v6788_v28  ;;  %v2382_v3 = vld [vmem:[%s8366_s5 + $0xc0] sm:$0xff]  ;;  %v6041_v4 = vpack.c.bf16 %v2307_v2, %v2306_v1 }
  0x6f   :  { %5187 = vmatprep.mubr.msk.f32.mxu1 %vm106_vm3, %v6788_v28  ;;  %5991 = vmatprep.subr.msk.bf16.mxu0 %vm6720_vm2, %v5989_v8 }
  0x70   :  { %5144 = vmatmul.mubr.msk.f32.gmra.mrb[2].mxu0 %vm106_vm3, %v6795_v29  ;;  %6001 = vmatprep.subr.msk.bf16.mxu1 %vm6720_vm2, %v5999_v10 }
  0x71   :  { %5188 = vmatmul.mubr.msk.f32.gmra.mrb[2].mxu1 %vm106_vm3, %v6795_v29  ;;  %5146 = vmatprep.mubr.msk.f32.mxu0 %vm106_vm3, %v6826_v35 }
  0x72   :  { %5190 = vmatprep.mubr.msk.f32.mxu1 %vm106_vm3, %v6826_v35  ;;  %5994 = vmatpush3.bf16.msk.msra.mxu0 %vm6720_vm2, %v5989_v8  ;;  %v2359_v8 = vld [vmem:[%s8366_s5 + $0x8] sm:$0xff] }
  0x73   :  { %6004 = vmatpush3.bf16.msk.msra.mxu1 %vm6720_vm2, %v5999_v10  ;;  %6006 = vmatprep.subr.bf16.mxu0 %v7173_v15  ;;  %v6053_v10 = vpack.c.bf16 %v2284_v6, %v2283_v5  ;;  %v6109_v11 = vpack.c.bf16 %v2359_v8, %v2358_v7  ;;  %v2290_v7 = vld [vmem:[%s8365_s4 + $0x38] sm:$0xff]  ;;  %v2364_v8 = vld [vmem:[%s8366_s5 + $0x30] sm:$0xff] }
  0x74   :  { %5147 = vmatmul.mubr.msk.f32.gmra.mrb[4].mxu0 %vm106_vm3, %v6835_v37  ;;  %6016 = vmatprep.subr.bf16.mxu1 %v7179_v16 }
  0x75   :  { %5191 = vmatmul.mubr.msk.f32.gmra.mrb[4].mxu1 %vm106_vm3, %v6835_v37  ;;  %5149 = vmatprep.mubr.msk.f32.mxu0 %vm106_vm3, %v6852_v38 }
  0x76   :  { %5193 = vmatprep.mubr.msk.f32.mxu1 %vm106_vm3, %v6852_v38 }
  0x78   :  { %5150 = vmatmul.mubr.msk.f32.gmra.mrb[6].mxu0 %vm106_vm3, %v6859_v39 }
  0x79   :  { %5194 = vmatmul.mubr.msk.f32.gmra.mrb[6].mxu1 %vm106_vm3, %v6859_v39  ;;  %5152 = vmatprep.mubr.msk.f32.mxu0 %vm106_vm3, %v6870_v40 }
  0x7a   :  { %5196 = vmatprep.mubr.msk.f32.mxu1 %vm106_vm3, %v6870_v40 }
  0x7c   :  { %5153 = vmatmul.mubr.msk.f32.gmra.mrb[8].mxu0 %vm106_vm3, %v6877_v41 }
  0x7d   :  { %5197 = vmatmul.mubr.msk.f32.gmra.mrb[8].mxu1 %vm106_vm3, %v6877_v41  ;;  %5155 = vmatprep.mubr.msk.f32.mxu0 %vm106_vm3, %v6888_v42 }
  0x7e   :  { %5199 = vmatprep.mubr.msk.f32.mxu1 %vm106_vm3, %v6888_v42 }
  0x80   :  { %5156 = vmatmul.mubr.msk.f32.gmra.mrb[10].mxu0 %vm106_vm3, %v6895_v43 }
  0x81   :  { %5200 = vmatmul.mubr.msk.f32.gmra.mrb[10].mxu1 %vm106_vm3, %v6895_v43  ;;  %5158 = vmatprep.mubr.msk.f32.mxu0 %vm106_vm3, %v6906_v44 }
  0x82   :  { %5202 = vmatprep.mubr.msk.f32.mxu1 %vm106_vm3, %v6906_v44 }
  0x84   :  { %5159 = vmatmul.mubr.msk.f32.gmra.mrb[12].mxu0 %vm106_vm3, %v6913_v45 }
  0x85   :  { %5203 = vmatmul.mubr.msk.f32.gmra.mrb[12].mxu1 %vm106_vm3, %v6913_v45  ;;  %5161 = vmatprep.mubr.msk.f32.mxu0 %vm106_vm3, %v6924_v46 }
  0x86   :  { %5205 = vmatprep.mubr.msk.f32.mxu1 %vm106_vm3, %v6924_v46 }
  0x88   :  { %5162 = vmatmul.mubr.msk.f32.gmra.mrb[14].mxu0 %vm106_vm3, %v6931_v47 }
  0x89   :  { %5206 = vmatmul.mubr.msk.f32.gmra.mrb[14].mxu1 %vm106_vm3, %v6931_v47  ;;  %5164 = vmatprep.mubr.msk.f32.mxu0 %vm106_vm3, %v6942_v48 }
  0x8a   :  { %5208 = vmatprep.mubr.msk.f32.mxu1 %vm106_vm3, %v6942_v48 }
  0x8c   :  { %5165 = vmatmul.mubr.msk.f32.gmra.mrb[16].mxu0 %vm106_vm3, %v6949_v49 }
  0x8d   :  { %5209 = vmatmul.mubr.msk.f32.gmra.mrb[16].mxu1 %vm106_vm3, %v6949_v49  ;;  %5167 = vmatprep.mubr.msk.f32.mxu0 %vm106_vm3, %v6960_v50 }
  0x8e   :  { %5211 = vmatprep.mubr.msk.f32.mxu1 %vm106_vm3, %v6960_v50 }
  0x90   :  { %5168 = vmatmul.mubr.msk.f32.gmra.mrb[18].mxu0 %vm106_vm3, %v6967_v51 }
  0x91   :  { %5212 = vmatmul.mubr.msk.f32.gmra.mrb[18].mxu1 %vm106_vm3, %v6967_v51  ;;  %5170 = vmatprep.mubr.msk.f32.mxu0 %vm106_vm3, %v6978_v52 }
  0x92   :  { %5214 = vmatprep.mubr.msk.f32.mxu1 %vm106_vm3, %v6978_v52 }
  0x94   :  { %5171 = vmatmul.mubr.msk.f32.gmra.mrb[20].mxu0 %vm106_vm3, %v6985_v53 }
  0x95   :  { %5215 = vmatmul.mubr.msk.f32.gmra.mrb[20].mxu1 %vm106_vm3, %v6985_v53  ;;  %5173 = vmatprep.mubr.msk.f32.mxu0 %vm106_vm3, %v6996_v54 }
  0x96   :  { %5217 = vmatprep.mubr.msk.f32.mxu1 %vm106_vm3, %v6996_v54 }
  0x98   :  { %5174 = vmatmul.mubr.msk.f32.gmra.mrb[22].mxu0 %vm106_vm3, %v7266_v17 }
  0x99   :  { %5218 = vmatmul.mubr.msk.f32.gmra.mrb[22].mxu1 %vm106_vm3, %v7266_v17  ;;  %5228 = vmatprep.mubr.msk.f32.mxu0 %vm106_vm3, %v6776_v24 }
  0x9a   :  { %5272 = vmatprep.mubr.msk.f32.mxu1 %vm106_vm3, %v6776_v24  ;;  %v2373_v24 = vld [vmem:[%s8366_s5 + $0x78] sm:$0xff] }
  0x9b   :  { %v7320_v31 = vpack.c.bf16 %v2374_v27, %v2373_v24 }
  0x9c   :  { %5229 = vmatmul.mubr.msk.f32.vlgmr.msra.gmra.mrb[0].mxu0 %vm106_vm3, %v6788_v28 }
  0x9d   :  { %5273 = vmatmul.mubr.msk.f32.vlgmr.msra.gmra.mrb[0].mxu1 %vm106_vm3, %v6788_v28  ;;  %6008 = vmatpush3.bf16.msra.mxu0 %v7173_v15 }
  0x9e   :  { %6018 = vmatpush3.bf16.msra.mxu1 %v7179_v16  ;;  %5231 = vmatprep.mubr.msk.f32.mxu0 %vm106_vm3, %v6795_v29 }
  0x9f   :  { %5275 = vmatprep.mubr.msk.f32.mxu1 %vm106_vm3, %v6795_v29  ;;  %6011 = vmatprep.subr.msk.bf16.mxu0 %vm6720_vm2, %v6009_v22 }
  0xa0   :  { %5232 = vmatmul.mubr.msk.f32.gmra.mrb[2].mxu0 %vm106_vm3, %v6826_v35  ;;  %6021 = vmatprep.subr.msk.bf16.mxu1 %vm6720_vm2, %v6019_v23 }
  0xa1   :  { %5276 = vmatmul.mubr.msk.f32.gmra.mrb[2].mxu1 %vm106_vm3, %v6826_v35  ;;  %5234 = vmatprep.mubr.msk.f32.mxu0 %vm106_vm3, %v6835_v37 }
  0xa2   :  { %5278 = vmatprep.mubr.msk.f32.mxu1 %vm106_vm3, %v6835_v37  ;;  %6014 = vmatpush3.bf16.msk.msra.mxu0 %vm6720_vm2, %v6009_v22 }
  0xa3   :  { %6024 = vmatpush3.bf16.msk.msra.mxu1 %vm6720_vm2, %v6019_v23  ;;  %6026 = vmatprep.subr.bf16.mxu0 %v7314_v30 }
  0xa4   :  { %5235 = vmatmul.mubr.msk.f32.gmra.mrb[4].mxu0 %vm106_vm3, %v6852_v38  ;;  %6082 = vmatprep.subr.bf16.mxu1 %v7320_v31 }
  0xa5   :  { %5279 = vmatmul.mubr.msk.f32.gmra.mrb[4].mxu1 %vm106_vm3, %v6852_v38  ;;  %5237 = vmatprep.mubr.msk.f32.mxu0 %vm106_vm3, %v6859_v39 }
  0xa6   :  { %5281 = vmatprep.mubr.msk.f32.mxu1 %vm106_vm3, %v6859_v39 }
  0xa8   :  { %5238 = vmatmul.mubr.msk.f32.gmra.mrb[6].mxu0 %vm106_vm3, %v6870_v40 }
  0xa9   :  { %5282 = vmatmul.mubr.msk.f32.gmra.mrb[6].mxu1 %vm106_vm3, %v6870_v40  ;;  %5240 = vmatprep.mubr.msk.f32.mxu0 %vm106_vm3, %v6877_v41 }
  0xaa   :  { %5284 = vmatprep.mubr.msk.f32.mxu1 %vm106_vm3, %v6877_v41 }
  0xac   :  { %5241 = vmatmul.mubr.msk.f32.gmra.mrb[8].mxu0 %vm106_vm3, %v6888_v42 }
  0xad   :  { %5285 = vmatmul.mubr.msk.f32.gmra.mrb[8].mxu1 %vm106_vm3, %v6888_v42  ;;  %5243 = vmatprep.mubr.msk.f32.mxu0 %vm106_vm3, %v6895_v43 }
  0xae   :  { %5287 = vmatprep.mubr.msk.f32.mxu1 %vm106_vm3, %v6895_v43 }
  0xb0   :  { %5244 = vmatmul.mubr.msk.f32.gmra.mrb[10].mxu0 %vm106_vm3, %v6906_v44 }
  0xb1   :  { %5288 = vmatmul.mubr.msk.f32.gmra.mrb[10].mxu1 %vm106_vm3, %v6906_v44  ;;  %5246 = vmatprep.mubr.msk.f32.mxu0 %vm106_vm3, %v6913_v45 }
  0xb2   :  { %5290 = vmatprep.mubr.msk.f32.mxu1 %vm106_vm3, %v6913_v45 }
  0xb4   :  { %5247 = vmatmul.mubr.msk.f32.gmra.mrb[12].mxu0 %vm106_vm3, %v6924_v46 }
  0xb5   :  { %5291 = vmatmul.mubr.msk.f32.gmra.mrb[12].mxu1 %vm106_vm3, %v6924_v46  ;;  %5249 = vmatprep.mubr.msk.f32.mxu0 %vm106_vm3, %v6931_v47 }
  0xb6   :  { %5293 = vmatprep.mubr.msk.f32.mxu1 %vm106_vm3, %v6931_v47 }
  0xb8   :  { %5250 = vmatmul.mubr.msk.f32.gmra.mrb[14].mxu0 %vm106_vm3, %v6942_v48 }
  0xb9   :  { %5294 = vmatmul.mubr.msk.f32.gmra.mrb[14].mxu1 %vm106_vm3, %v6942_v48  ;;  %5252 = vmatprep.mubr.msk.f32.mxu0 %vm106_vm3, %v6949_v49 }
  0xba   :  { %5296 = vmatprep.mubr.msk.f32.mxu1 %vm106_vm3, %v6949_v49 }
  0xbc   :  { %5253 = vmatmul.mubr.msk.f32.gmra.mrb[16].mxu0 %vm106_vm3, %v6960_v50 }
  0xbd   :  { %5297 = vmatmul.mubr.msk.f32.gmra.mrb[16].mxu1 %vm106_vm3, %v6960_v50  ;;  %5255 = vmatprep.mubr.msk.f32.mxu0 %vm106_vm3, %v6967_v51 }
  0xbe   :  { %5299 = vmatprep.mubr.msk.f32.mxu1 %vm106_vm3, %v6967_v51 }
  0xc0   :  { %5256 = vmatmul.mubr.msk.f32.gmra.mrb[18].mxu0 %vm106_vm3, %v6978_v52 }
  0xc1   :  { %5300 = vmatmul.mubr.msk.f32.gmra.mrb[18].mxu1 %vm106_vm3, %v6978_v52  ;;  %5258 = vmatprep.mubr.msk.f32.mxu0 %vm106_vm3, %v6985_v53 }
  0xc2   :  { %5302 = vmatprep.mubr.msk.f32.mxu1 %vm106_vm3, %v6985_v53 }
  0xc4   :  { %5259 = vmatmul.mubr.msk.f32.gmra.mrb[20].mxu0 %vm106_vm3, %v6996_v54 }
  0xc5   :  { %5303 = vmatmul.mubr.msk.f32.gmra.mrb[20].mxu1 %vm106_vm3, %v6996_v54  ;;  %5261 = vmatprep.mubr.msk.f32.mxu0 %vm106_vm3, %v7266_v17 }
  0xc6   :  { %5305 = vmatprep.mubr.msk.f32.mxu1 %vm106_vm3, %v7266_v17 }
  0xc8   :  { %5262 = vmatmul.mubr.msk.f32.gmra.mrb[22].mxu0 %vm106_vm3, %v7407_v9 }
  0xc9   :  { %5306 = vmatmul.mubr.msk.f32.gmra.mrb[22].mxu1 %vm106_vm3, %v7407_v9  ;;  %5316 = vmatprep.mubr.msk.f32.mxu0 %vm106_vm3, %v6788_v28 }
  0xca   :  { %5360 = vmatprep.mubr.msk.f32.mxu1 %vm106_vm3, %v6788_v28  ;;  %v2377_v28 = vld [vmem:[%s8366_s5 + $0x98] sm:$0xff] }
  0xcb   :  { %v6089_v60 = vpack.c.bf16 %v2378_v59, %v2377_v28  ;;  %v2285_v28 = vld [vmem:[%s8365_s4 + $0x10] sm:$0xff] }
  0xcc   :  { %5317 = vmatmul.mubr.msk.f32.vlgmr.msra.gmra.mrb[0].mxu0 %vm106_vm3, %v6795_v29 }
  0xcd   :  { %5361 = vmatmul.mubr.msk.f32.vlgmr.msra.gmra.mrb[0].mxu1 %vm106_vm3, %v6795_v29  ;;  %5319 = vmatprep.mubr.msk.f32.mxu0 %vm106_vm3, %v6826_v35  ;;  %v6033_v29 = vpack.c.bf16 %v2303_v58, %v2302_v57 }
  0xce   :  { %5363 = vmatprep.mubr.msk.f32.mxu1 %vm106_vm3, %v6826_v35  ;;  %6028 = vmatpush3.bf16.msra.mxu0 %v7314_v30  ;;  %v2379_v35 = vld [vmem:[%s8366_s5 + $0xa8] sm:$0xff] }
  0xcf   :  { %6084 = vmatpush3.bf16.msra.mxu1 %v7320_v31  ;;  %6030 = vmatprep.subr.bf16.mxu0 %v6029_v55  ;;  %v7609_v31 = vld [vmem:[%s8367_s3] ss:$0 sm:$0xff] }
  0xd0   :  { %5320 = vmatmul.mubr.msk.f32.gmra.mrb[2].mxu0 %vm106_vm3, %v6835_v37  ;;  %6086 = vmatprep.subr.bf16.mxu1 %v6085_v56 }
  0xd1   :  { %5364 = vmatmul.mubr.msk.f32.gmra.mrb[2].mxu1 %vm106_vm3, %v6835_v37  ;;  %5322 = vmatprep.mubr.msk.f32.mxu0 %vm106_vm3, %v6852_v38  ;;  %v6093_v37 = vpack.c.bf16 %v2380_v63, %v2379_v35 }
  0xd2   :  { %5366 = vmatprep.mubr.msk.f32.mxu1 %vm106_vm3, %v6852_v38  ;;  %6032 = vmatpush3.bf16.msra.mxu0 %v6029_v55  ;;  %v2381_v38 = vld [vmem:[%s8366_s5 + $0xb8] sm:$0xff] }
  0xd3   :  { %6088 = vmatpush3.bf16.msra.mxu1 %v6085_v56  ;;  %6034 = vmatprep.subr.bf16.mxu0 %v6033_v29 }
  0xd4   :  { %5323 = vmatmul.mubr.msk.f32.gmra.mrb[4].mxu0 %vm106_vm3, %v6859_v39  ;;  %6090 = vmatprep.subr.bf16.mxu1 %v6089_v60 }
  0xd5   :  { %5367 = vmatmul.mubr.msk.f32.gmra.mrb[4].mxu1 %vm106_vm3, %v6859_v39  ;;  %5325 = vmatprep.mubr.msk.f32.mxu0 %vm106_vm3, %v6870_v40  ;;  %v6097_v39 = vpack.c.bf16 %v2382_v3, %v2381_v38 }
  0xd6   :  { %5369 = vmatprep.mubr.msk.f32.mxu1 %vm106_vm3, %v6870_v40  ;;  %6036 = vmatpush3.bf16.msra.mxu0 %v6033_v29  ;;  %v65_v40 = vld [vmem:[%s8364_s0 + $0xd8] sm:$0xff] }
  0xd7   :  { %6092 = vmatpush3.bf16.msra.mxu1 %v6089_v60  ;;  %6038 = vmatprep.subr.bf16.mxu0 %v6037_v0  ;;  %v2286_v60 = vld [vmem:[%s8365_s4 + $0x18] sm:$0xff] }
  0xd8   :  { %5326 = vmatmul.mubr.msk.f32.gmra.mrb[6].mxu0 %vm106_vm3, %v6877_v41  ;;  %6094 = vmatprep.subr.bf16.mxu1 %v6093_v37  ;;  %v6057_v3 = vpack.c.bf16 %v2286_v60, %v2285_v28  ;;  %v2368_v60 = vld [vmem:[%s8366_s5 + $0x50] sm:$0xff] }
  0xd9   :  { %5370 = vmatmul.mubr.msk.f32.gmra.mrb[6].mxu1 %vm106_vm3, %v6877_v41  ;;  %5328 = vmatprep.mubr.msk.f32.mxu0 %vm106_vm3, %v6888_v42  ;;  %v2308_v41 = vld [vmem:[%s8365_s4 + $0xc8] sm:$0xff] }
  0xda   :  { %5372 = vmatprep.mubr.msk.f32.mxu1 %vm106_vm3, %v6888_v42  ;;  %6040 = vmatpush3.bf16.msra.mxu0 %v6037_v0  ;;  %v2309_v42 = vld [vmem:[%s8365_s4 + $0xd0] sm:$0xff] }
  0xdb   :  { %6096 = vmatpush3.bf16.msra.mxu1 %v6093_v37  ;;  %6042 = vmatprep.subr.bf16.mxu0 %v6041_v4 }
  0xdc   :  { %5329 = vmatmul.mubr.msk.f32.gmra.mrb[8].mxu0 %vm106_vm3, %v6895_v43  ;;  %6098 = vmatprep.subr.bf16.mxu1 %v6097_v39 }
  0xdd   :  { %5373 = vmatmul.mubr.msk.f32.gmra.mrb[8].mxu1 %vm106_vm3, %v6895_v43  ;;  %5331 = vmatprep.mubr.msk.f32.mxu0 %vm106_vm3, %v6906_v44  ;;  %v2383_v43 = vld [vmem:[%s8366_s5 + $0xc8] sm:$0xff] }
  0xde   :  { %5375 = vmatprep.mubr.msk.f32.mxu1 %vm106_vm3, %v6906_v44  ;;  %6044 = vmatpush3.bf16.msra.mxu0 %v6041_v4  ;;  %v6045_v44 = vpack.c.bf16 %v2309_v42, %v2308_v41  ;;  %v6113_v4 = vpack.c.bf16 %v2361_v62, %v2360_v61  ;;  %v2288_v42 = vld [vmem:[%s8365_s4 + $0x28] sm:$0xff]  ;;  %v2369_v61 = vld [vmem:[%s8366_s5 + $0x58] sm:$0xff] }
  0xdf   :  { %6100 = vmatpush3.bf16.msra.mxu1 %v6097_v39  ;;  %v2287_v39 = vld [vmem:[%s8365_s4 + $0x20] sm:$0xff] }
  0xe0   :  { %5332 = vmatmul.mubr.msk.f32.gmra.mrb[10].mxu0 %vm106_vm3, %v6913_v45  ;;  %6046 = vmatprep.subr.bf16.mxu0 %v6045_v44 }
  0xe1   :  { %5376 = vmatmul.mubr.msk.f32.gmra.mrb[10].mxu1 %vm106_vm3, %v6913_v45  ;;  %5334 = vmatprep.mubr.msk.f32.mxu0 %vm106_vm3, %v6924_v46  ;;  %v2384_v45 = vld [vmem:[%s8366_s5 + $0xd0] sm:$0xff] }
  0xe2   :  { %5378 = vmatprep.mubr.msk.f32.mxu1 %vm106_vm3, %v6924_v46  ;;  %v6101_v46 = vpack.c.bf16 %v2384_v45, %v2383_v43  ;;  %6048 = vmatpush3.bf16.msra.mxu0 %v6045_v44  ;;  %v2362_v43 = vld [vmem:[%s8366_s5 + $0x20] sm:$0xff]  ;;  %v2363_v44 = vld [vmem:[%s8366_s5 + $0x28] sm:$0xff] }
  0xe4   :  { %5335 = vmatmul.mubr.msk.f32.gmra.mrb[12].mxu0 %vm106_vm3, %v6931_v47  ;;  %6102 = vmatprep.subr.bf16.mxu1 %v6101_v46 }
  0xe5   :  { %5379 = vmatmul.mubr.msk.f32.gmra.mrb[12].mxu1 %vm106_vm3, %v6931_v47  ;;  %5337 = vmatprep.mubr.msk.f32.mxu0 %vm106_vm3, %v6942_v48  ;;  %v2310_v47 = vld [vmem:[%s8365_s4 + $0xd8] sm:$0xff] }
  0xe6   :  { %5381 = vmatprep.mubr.msk.f32.mxu1 %vm106_vm3, %v6942_v48  ;;  %6104 = vmatpush3.bf16.msra.mxu1 %v6101_v46  ;;  %v2311_v48 = vld [vmem:[%s8365_s4 + $0xe0] sm:$0xff] }
  0xe8   :  { %5338 = vmatmul.mubr.msk.f32.gmra.mrb[14].mxu0 %vm106_vm3, %v6949_v49 }
  0xe9   :  { %5382 = vmatmul.mubr.msk.f32.gmra.mrb[14].mxu1 %vm106_vm3, %v6949_v49  ;;  %5340 = vmatprep.mubr.msk.f32.mxu0 %vm106_vm3, %v6960_v50  ;;  %v2385_v49 = vld [vmem:[%s8366_s5 + $0xd8] sm:$0xff] }
  0xea   :  { %5384 = vmatprep.mubr.msk.f32.mxu1 %vm106_vm3, %v6960_v50  ;;  %v6049_v50 = vpack.c.bf16 %v2311_v48, %v2310_v47 }
  0xec   :  { %5341 = vmatmul.mubr.msk.f32.gmra.mrb[16].mxu0 %vm106_vm3, %v6967_v51  ;;  %6050 = vmatprep.subr.bf16.mxu0 %v6049_v50 }
  0xed   :  { %5385 = vmatmul.mubr.msk.f32.gmra.mrb[16].mxu1 %vm106_vm3, %v6967_v51  ;;  %5343 = vmatprep.mubr.msk.f32.mxu0 %vm106_vm3, %v6978_v52  ;;  %v2386_v51 = vld [vmem:[%s8366_s5 + $0xe0] sm:$0xff] }
  0xee   :  { %5387 = vmatprep.mubr.msk.f32.mxu1 %vm106_vm3, %v6978_v52  ;;  %v6105_v52 = vpack.c.bf16 %v2386_v51, %v2385_v49  ;;  %6052 = vmatpush3.bf16.msra.mxu0 %v6049_v50 }
  0xf0   :  { %5344 = vmatmul.mubr.msk.f32.gmra.mrb[18].mxu0 %vm106_vm3, %v6985_v53  ;;  %6106 = vmatprep.subr.bf16.mxu1 %v6105_v52 }
  0xf1   :  { %5388 = vmatmul.mubr.msk.f32.gmra.mrb[18].mxu1 %vm106_vm3, %v6985_v53  ;;  %5346 = vmatprep.mubr.msk.f32.mxu0 %vm106_vm3, %v6996_v54  ;;  %v2312_v53 = vld [vmem:[%s8365_s4 + $0xe8] sm:$0xff] }
  0xf2   :  { %5390 = vmatprep.mubr.msk.f32.mxu1 %vm106_vm3, %v6996_v54  ;;  %6108 = vmatpush3.bf16.msra.mxu1 %v6105_v52  ;;  %v2387_v54 = vld [vmem:[%s8366_s5 + $0xe8] sm:$0xff]  ;;  %v6061_v52 = vpack.c.bf16 %v2288_v42, %v2287_v39  ;;  %v2295_v39 = vld [vmem:[%s8365_s4 + $0x60] sm:$0xff] }
  0xf3   :  { %5424 = vmatprep.subr.mxu0 %v2312_v53  ;;  %5508 = vmatprep.subr.mxu1 %v2387_v54  ;;  %v2296_v42 = vld [vmem:[%s8365_s4 + $0x68] sm:$0xff] }
  0xf4   :  { %5347 = vmatmul.mubr.msk.f32.gmra.mrb[20].mxu0 %vm106_vm3, %v7266_v17 }
  0xf5   :  { %5391 = vmatmul.mubr.msk.f32.gmra.mrb[20].mxu1 %vm106_vm3, %v7266_v17  ;;  %5349 = vmatprep.mubr.msk.f32.mxu0 %vm106_vm3, %v7407_v9 }
  0xf6   :  { %5393 = vmatprep.mubr.msk.f32.mxu1 %vm106_vm3, %v7407_v9  ;;  %5425 = vmatpush3.msra.mxu0 %v2312_v53  ;;  %v6117_v53 = vpack.c.bf16 %v2363_v44, %v2362_v43  ;;  %v2370_v43 = vld [vmem:[%s8366_s5 + $0x60] sm:$0xff]  ;;  %v2371_v44 = vld [vmem:[%s8366_s5 + $0x68] sm:$0xff] }
  0xf7   :  { %5509 = vmatpush3.msra.mxu1 %v2387_v54  ;;  %6054 = vmatprep.subr.bf16.mxu0 %v6053_v10  ;;  %v2289_v54 = vld [vmem:[%s8365_s4 + $0x30] sm:$0xff] }
  0xf8   :  { %5350 = vmatmul.mubr.msk.f32.gmra.mrb[22].mxu0 %vm106_vm3, %v65_v40  ;;  %6110 = vmatprep.subr.bf16.mxu1 %v6109_v11 }
  0xf9   :  { %5394 = vmatmul.mubr.msk.f32.gmra.mrb[22].mxu1 %vm106_vm3, %v65_v40 }
 0x19f   :  { %v5318_v12 = vpop.f32.mrb[0].mxu0 }
 0x1a0   :  { %v5362_v13 = vpop.f32.mrb[0].mxu1  ;;  %v1861_v14 = vpop.f32.mrb[1].mxu0 }
 0x1a1   :  { %v2216_v15 = vmax.f32 %v1861_v14, %v5318_v12  ;;  %v2073_v16 = vpop.f32.mrb[1].mxu1 }
 0x1a2   :  { %v2228_v17 = vmax.f32 %v2073_v16, %v5362_v13 }
 0x1a3   :  { %v5321_v18 = vpop.f32.mrb[2].mxu0 }
 0x1a4   :  { %v7604_v19 = vmax.f32 %v2216_v15, %v2228_v17  ;;  %v5365_v20 = vpop.f32.mrb[2].mxu1  ;;  %v1871_v21 = vpop.f32.mrb[3].mxu0 }
 0x1a5   :  { %v2217_v22 = vmax.f32 %v1871_v21, %v5321_v18  ;;  %v2083_v23 = vpop.f32.mrb[3].mxu1  ;;  %v6065_v18 = vpack.c.bf16 %v2290_v7, %v2289_v54  ;;  %v2291_v21 = vld [vmem:[%s8365_s4 + $0x40] sm:$0xff]  ;;  %v6133_v54 = vpack.c.bf16 %v2371_v44, %v2370_v43  ;;  %v2395_v43 = vld [vmem:[%s8366_s5 + $0x128] sm:$0xff]  ;;  %v2321_v44 = vld [vmem:[%s8365_s4 + $0x130] sm:$0xff] }
 0x1a6   :  { %v2229_v25 = vmax.f32 %v2083_v23, %v5365_v20  ;;  %v2259_v7 = vadd.f32 %v7609_v31, %v7604_v19 }
 0x1a7   :  { %v5324_v26 = vpop.f32.mrb[4].mxu0 }
 0x1a8   :  { %v2241_v24 = vmax.f32 %v2217_v22, %v2229_v25  ;;  %v5368_v27 = vpop.f32.mrb[4].mxu1  ;;  %v1881_v30 = vpop.f32.mrb[5].mxu0  ;;  %v2292_v25 = vld [vmem:[%s8365_s4 + $0x48] sm:$0xff] }
 0x1a9   :  { %v2218_v9 = vmax.f32 %v1881_v30, %v5324_v26  ;;  %v2093_v32 = vpop.f32.mrb[5].mxu1  ;;  %v2366_v26 = vld [vmem:[%s8366_s5 + $0x40] sm:$0xff] }
 0x1aa   :  { %v2260_v33 = vadd.f32 %v7609_v31, %v2241_v24  ;;  %v2230_v34 = vmax.f32 %v2093_v32, %v5368_v27  ;;  %v2367_v24 = vld [vmem:[%s8366_s5 + $0x48] sm:$0xff] }
 0x1ab   :  { %v5327_v36 = vpop.f32.mrb[6].mxu0 }
 0x1ac   :  { %v7612_v55 = vmax.f32 %v2260_v33, 0.0  ;;  %v2242_v56 = vmax.f32 %v2218_v9, %v2230_v34  ;;  %v5371_v57 = vpop.f32.mrb[6].mxu1  ;;  %v1891_v58 = vpop.f32.mrb[7].mxu0 }
 0x1ad   :  { %v2219_v59 = vmax.f32 %v1891_v58, %v5327_v36  ;;  %v2103_v29 = vpop.f32.mrb[7].mxu1  ;;  %v2293_v58 = vld [vmem:[%s8365_s4 + $0x50] sm:$0xff] }
 0x1ae   :  { %v2261_v35 = vadd.f32 %v7609_v31, %v2242_v56  ;;  %v2231_v63 = vmax.f32 %v2103_v29, %v5371_v57  ;;  %5426 = vmatprep.mubr.msk.f32.mxu0 %vm2433_vm4, %v7612_v55  ;;  %5510 = vmatprep.mubr.msk.f32.mxu1 %vm2433_vm4, %v7612_v55  ;;  %v6069_v56 = vpack.c.bf16 %v2292_v25, %v2291_v21  ;;  %v2294_v29 = vld [vmem:[%s8365_s4 + $0x58] sm:$0xff]  ;;  %v2313_v21 = vld [vmem:[%s8365_s4 + $0xf0] sm:$0xff] }
 0x1af   :  { %v5330_v0 = vpop.f32.mrb[8].mxu0  ;;  %v6125_v57 = vpack.c.bf16 %v2367_v24, %v2366_v26  ;;  %v2314_v26 = vld [vmem:[%s8365_s4 + $0xf8] sm:$0xff]  ;;  %v2388_v24 = vld [vmem:[%s8366_s5 + $0xf0] sm:$0xff] }
 0x1b0   :  { %v7631_v37 = vmax.f32 %v2261_v35, 0.0  ;;  %v2243_v1 = vmax.f32 %v2219_v59, %v2231_v63  ;;  %v5374_v2 = vpop.f32.mrb[8].mxu1  ;;  %v1901_v38 = vpop.f32.mrb[9].mxu0 }
 0x1b1   :  { %v2220_v40 = vmax.f32 %v1901_v38, %v5330_v0  ;;  %v2113_v41 = vpop.f32.mrb[9].mxu1 }
 0x1b2   :  { %v2262_v45 = vadd.f32 %v7609_v31, %v2243_v1  ;;  %v2232_v46 = vmax.f32 %v2113_v41, %v5374_v2  ;;  %5427 = vmatmul.mubr.msk.f32.vlgmr.msra.gmra.mrb[24].mxu0 %vm2433_vm4, %v7631_v37  ;;  %5511 = vmatmul.mubr.msk.f32.vlgmr.msra.gmra.mrb[24].mxu1 %vm2433_vm4, %v7631_v37 }
 0x1b3   :  { %6056 = vmatpush3.bf16.msra.mxu0 %v6053_v10  ;;  %6112 = vmatpush3.bf16.msra.mxu1 %v6109_v11  ;;  %v5333_v47 = vpop.f32.mrb[10].mxu0  ;;  %v2365_v10 = vld [vmem:[%s8366_s5 + $0x38] sm:$0xff] }
 0x1b4   :  { %v7650_v48 = vmax.f32 %v2262_v45, 0.0  ;;  %v2244_v49 = vmax.f32 %v2220_v40, %v2232_v46  ;;  %v5377_v50 = vpop.f32.mrb[10].mxu1  ;;  %v1911_v51 = vpop.f32.mrb[11].mxu0  ;;  %6058 = vmatprep.subr.bf16.mxu0 %v6057_v3  ;;  %6114 = vmatprep.subr.bf16.mxu1 %v6113_v4  ;;  %v6121_v20 = vpack.c.bf16 %v2365_v10, %v2364_v8 }
 0x1b5   :  { %v2221_v5 = vmax.f32 %v1911_v51, %v5333_v47  ;;  %v2123_v6 = vpop.f32.mrb[11].mxu1 }
 0x1b6   :  { %v2263_v11 = vadd.f32 %v7609_v31, %v2244_v49  ;;  %v2233_v12 = vmax.f32 %v2123_v6, %v5377_v50  ;;  %5429 = vmatprep.mubr.msk.f32.mxu0 %vm2433_vm4, %v7650_v48  ;;  %5513 = vmatprep.mubr.msk.f32.mxu1 %vm2433_vm4, %v7650_v48 }
 0x1b7   :  { %6060 = vmatpush3.bf16.msra.mxu0 %v6057_v3  ;;  %6116 = vmatpush3.bf16.msra.mxu1 %v6113_v4  ;;  %v5336_v13 = vpop.f32.mrb[12].mxu0  ;;  %v6073_v3 = vpack.c.bf16 %v2294_v29, %v2293_v58  ;;  %v6129_v4 = vpack.c.bf16 %v2369_v61, %v2368_v60  ;;  %v2316_v60 = vld [vmem:[%s8365_s4 + $0x108] sm:$0xff]  ;;  %v2390_v61 = vld [vmem:[%s8366_s5 + $0x100] sm:$0xff] }
 0x1b8   :  { %v7669_v14 = vmax.f32 %v2263_v11, 0.0  ;;  %v2245_v15 = vmax.f32 %v2221_v5, %v2233_v12  ;;  %v5380_v16 = vpop.f32.mrb[12].mxu1  ;;  %v1921_v17 = vpop.f32.mrb[13].mxu0  ;;  %6062 = vmatprep.subr.bf16.mxu0 %v6061_v52  ;;  %6118 = vmatprep.subr.bf16.mxu1 %v6117_v53 }
 0x1b9   :  { %v2222_v22 = vmax.f32 %v1921_v17, %v5336_v13  ;;  %v2133_v23 = vpop.f32.mrb[13].mxu1 }
 0x1ba   :  { %v2264_v27 = vadd.f32 %v7609_v31, %v2245_v15  ;;  %v2234_v30 = vmax.f32 %v2133_v23, %v5380_v16  ;;  %5430 = vmatmul.mubr.msk.f32.gmra.mrb[26].mxu0 %vm2433_vm4, %v7669_v14  ;;  %5514 = vmatmul.mubr.msk.f32.gmra.mrb[26].mxu1 %vm2433_vm4, %v7669_v14 }
 0x1bb   :  { %6064 = vmatpush3.bf16.msra.mxu0 %v6061_v52  ;;  %6120 = vmatpush3.bf16.msra.mxu1 %v6117_v53  ;;  %v5339_v9 = vpop.f32.mrb[14].mxu0  ;;  %v6077_v53 = vpack.c.bf16 %v2296_v42, %v2295_v39  ;;  %v2394_v42 = vld [vmem:[%s8366_s5 + $0x120] sm:$0xff] }
 0x1bc   :  { %v7688_v32 = vmax.f32 %v2264_v27, 0.0  ;;  %v2246_v33 = vmax.f32 %v2222_v22, %v2234_v30  ;;  %v5383_v34 = vpop.f32.mrb[14].mxu1  ;;  %v1931_v36 = vpop.f32.mrb[15].mxu0  ;;  %6066 = vmatprep.subr.bf16.mxu0 %v6065_v18  ;;  %6122 = vmatprep.subr.bf16.mxu1 %v6121_v20  ;;  %v2271_v22 = vmax.f32 %v2259_v7, 0.0  ;;  %v2389_v27 = vld [vmem:[%s8366_s5 + $0xf8] sm:$0xff]  ;;  %v2399_v7 = vld [vmem:[%s8366_s5 + $0x148] sm:$0xff] }
 0x1bd   :  { %v2223_v28 = vmax.f32 %v1931_v36, %v5339_v9  ;;  %v2143_v59 = vpop.f32.mrb[15].mxu1  ;;  %v6165_v58 = vpack.c.bf16 %v2389_v27, %v2388_v24  ;;  %v2330_v27 = vld [vmem:[%s8365_s4 + $0x178] sm:$0xff] }
 0x1be   :  { %v2265_v62 = vadd.f32 %v7609_v31, %v2246_v33  ;;  %v2235_v35 = vmax.f32 %v2143_v59, %v5383_v34  ;;  %5432 = vmatprep.mubr.msk.f32.mxu0 %vm2433_vm4, %v7688_v32  ;;  %5516 = vmatprep.mubr.msk.f32.mxu1 %vm2433_vm4, %v7688_v32 }
 0x1bf   :  { %6068 = vmatpush3.bf16.msra.mxu0 %v6065_v18  ;;  %6124 = vmatpush3.bf16.msra.mxu1 %v6121_v20  ;;  %v5342_v63 = vpop.f32.mrb[16].mxu0  ;;  %v2297_v18 = vld [vmem:[%s8365_s4 + $0x70] sm:$0xff] }
 0x1c0   :  { %v7707_v0 = vmax.f32 %v2265_v62, 0.0  ;;  %v2247_v1 = vmax.f32 %v2223_v28, %v2235_v35  ;;  %v5386_v2 = vpop.f32.mrb[16].mxu1  ;;  %v1941_v38 = vpop.f32.mrb[17].mxu0  ;;  %6070 = vmatprep.subr.bf16.mxu0 %v6069_v56  ;;  %6126 = vmatprep.subr.bf16.mxu1 %v6125_v57  ;;  %v2372_v20 = vld [vmem:[%s8366_s5 + $0x70] sm:$0xff]  ;;  %v2315_v28 = vld [vmem:[%s8365_s4 + $0x100] sm:$0xff]  ;;  %v2391_v62 = vld [vmem:[%s8366_s5 + $0x108] sm:$0xff] }
 0x1c1   :  { %v2224_v40 = vmax.f32 %v1941_v38, %v5342_v63  ;;  %v2153_v41 = vpop.f32.mrb[17].mxu1  ;;  %v6141_v63 = vpack.c.bf16 %v2316_v60, %v2315_v28  ;;  %v2408_v28 = vld [vmem:[%s8366_s5 + $0x190] sm:$0xff] }
 0x1c2   :  { %v2266_v45 = vadd.f32 %v7609_v31, %v2247_v1  ;;  %v2236_v46 = vmax.f32 %v2153_v41, %v5386_v2  ;;  %5433 = vmatmul.mubr.msk.f32.gmra.mrb[28].mxu0 %vm2433_vm4, %v7707_v0  ;;  %5517 = vmatmul.mubr.msk.f32.gmra.mrb[28].mxu1 %vm2433_vm4, %v7707_v0  ;;  %v6169_v1 = vpack.c.bf16 %v2391_v62, %v2390_v61  ;;  %v2317_v2 = vld [vmem:[%s8365_s4 + $0x110] sm:$0xff]  ;;  %v2320_v41 = vld [vmem:[%s8365_s4 + $0x128] sm:$0xff]  ;;  %v2334_v61 = vld [vmem:[%s8365_s4 + $0x198] sm:$0xff] }
 0x1c3   :  { %6072 = vmatpush3.bf16.msra.mxu0 %v6069_v56  ;;  %6128 = vmatpush3.bf16.msra.mxu1 %v6125_v57  ;;  %v5345_v47 = vpop.f32.mrb[18].mxu0  ;;  %v6137_v57 = vpack.c.bf16 %v2314_v26, %v2313_v21  ;;  %v2329_v21 = vld [vmem:[%s8365_s4 + $0x170] sm:$0xff]  ;;  %v2335_v62 = vld [vmem:[%s8365_s4 + $0x1a0] sm:$0xff] }
 0x1c4   :  { %v7726_v49 = vmax.f32 %v2266_v45, 0.0  ;;  %v2248_v50 = vmax.f32 %v2224_v40, %v2236_v46  ;;  %v5389_v51 = vpop.f32.mrb[18].mxu1  ;;  %v1951_v52 = vpop.f32.mrb[19].mxu0  ;;  %6074 = vmatprep.subr.bf16.mxu0 %v6073_v3  ;;  %6130 = vmatprep.subr.bf16.mxu1 %v6129_v4  ;;  %v2319_v40 = vld [vmem:[%s8365_s4 + $0x120] sm:$0xff]  ;;  %v6177_v46 = vpack.c.bf16 %v2395_v43, %v2394_v42  ;;  %v2413_v43 = vld [vmem:[%s8366_s5 + $0x1b8] sm:$0xff] }
 0x1c5   :  { %v2225_v5 = vmax.f32 %v1951_v52, %v5345_v47  ;;  %v2163_v6 = vpop.f32.mrb[19].mxu1  ;;  %v6149_v45 = vpack.c.bf16 %v2320_v41, %v2319_v40  ;;  %v2322_v47 = vld [vmem:[%s8365_s4 + $0x138] sm:$0xff]  ;;  %v2339_v42 = vld [vmem:[%s8365_s4 + $0x1c0] sm:$0xff] }
 0x1c6   :  { %v2267_v8 = vadd.f32 %v7609_v31, %v2248_v50  ;;  %v2237_v10 = vmax.f32 %v2163_v6, %v5389_v51  ;;  %5435 = vmatprep.mubr.msk.f32.mxu0 %vm2433_vm4, %v7726_v49  ;;  %5519 = vmatprep.mubr.msk.f32.mxu1 %vm2433_vm4, %v7726_v49  ;;  %v2396_v50 = vld [vmem:[%s8366_s5 + $0x130] sm:$0xff]  ;;  %v2397_v51 = vld [vmem:[%s8366_s5 + $0x138] sm:$0xff]  ;;  %v6153_v52 = vpack.c.bf16 %v2322_v47, %v2321_v44  ;;  %v2398_v6 = vld [vmem:[%s8366_s5 + $0x140] sm:$0xff] }
 0x1c7   :  { %6076 = vmatpush3.bf16.msra.mxu0 %v6073_v3  ;;  %6132 = vmatpush3.bf16.msra.mxu1 %v6129_v4  ;;  %v5348_v11 = vpop.f32.mrb[20].mxu0  ;;  %v2392_v3 = vld [vmem:[%s8366_s5 + $0x110] sm:$0xff]  ;;  %v2393_v4 = vld [vmem:[%s8366_s5 + $0x118] sm:$0xff]  ;;  %v2414_v44 = vld [vmem:[%s8366_s5 + $0x1c0] sm:$0xff] }
 0x1c8   :  { %v7735_v12 = vmax.f32 %v2267_v8, 0.0  ;;  %v2249_v13 = vmax.f32 %v2225_v5, %v2237_v10  ;;  %v5392_v15 = vpop.f32.mrb[20].mxu1  ;;  %v1961_v16 = vpop.f32.mrb[21].mxu0  ;;  %6078 = vmatprep.subr.bf16.mxu0 %v6077_v53  ;;  %6134 = vmatprep.subr.bf16.mxu1 %v6133_v54  ;;  %v6173_v39 = vpack.c.bf16 %v2393_v4, %v2392_v3  ;;  %v2324_v5 = vld [vmem:[%s8365_s4 + $0x148] sm:$0xff]  ;;  %v6185_v10 = vpack.c.bf16 %v2399_v7, %v2398_v6  ;;  %v2337_v3 = vld [vmem:[%s8365_s4 + $0x1b0] sm:$0xff]  ;;  %v2343_v6 = vld [vmem:[%s8365_s4 + $0x1e0] sm:$0xff] }
 0x1c9   :  { %v2226_v19 = vmax.f32 %v1961_v16, %v5348_v11  ;;  %v2173_v17 = vpop.f32.mrb[21].mxu1  ;;  %v2325_v11 = vld [vmem:[%s8365_s4 + $0x150] sm:$0xff]  ;;  %v2411_v4 = vld [vmem:[%s8366_s5 + $0x1a8] sm:$0xff] }
 0x1ca   :  { %v7747_v23 = vadd.f32 %v7609_v31, %v2249_v13  ;;  %v2238_v25 = vmax.f32 %v2173_v17, %v5392_v15  ;;  %5436 = vmatmul.mubr.msk.f32.gmra.mrb[30].mxu0 %vm2433_vm4, %v7735_v12  ;;  %5520 = vmatmul.mubr.msk.f32.gmra.mrb[30].mxu1 %vm2433_vm4, %v7735_v12  ;;  %v2326_v13 = vld [vmem:[%s8365_s4 + $0x158] sm:$0xff]  ;;  %v2400_v15 = vld [vmem:[%s8366_s5 + $0x150] sm:$0xff]  ;;  %v2327_v17 = vld [vmem:[%s8365_s4 + $0x160] sm:$0xff] }
 0x1cb   :  { %6080 = vmatpush3.bf16.msra.mxu0 %v6077_v53  ;;  %6136 = vmatpush3.bf16.msra.mxu1 %v6133_v54  ;;  %v5351_v30 = vpop.f32.mrb[22].mxu0  ;;  %v6181_v53 = vpack.c.bf16 %v2397_v51, %v2396_v50  ;;  %v2323_v54 = vld [vmem:[%s8365_s4 + $0x140] sm:$0xff]  ;;  %v6161_v16 = vpack.c.bf16 %v2326_v13, %v2325_v11  ;;  %v2340_v47 = vld [vmem:[%s8365_s4 + $0x1c8] sm:$0xff]  ;;  %v2341_v50 = vld [vmem:[%s8365_s4 + $0x1d0] sm:$0xff] }
 0x1cc   :  { %v2250_v9 = vmax.f32 %v2226_v19, %v2238_v25  ;;  %5468 = vmatprep.mubr.msk.f32.mxu0 %vm2433_vm4, %v2271_v22  ;;  %5552 = vmatprep.mubr.msk.f32.mxu1 %vm2433_vm4, %v2271_v22  ;;  %v5395_v33 = vpop.f32.mrb[22].mxu1  ;;  %v1971_v34 = vpop.f32.mrb[23].mxu0  ;;  %v6157_v8 = vpack.c.bf16 %v2324_v5, %v2323_v54  ;;  %v2403_v22 = vld [vmem:[%s8366_s5 + $0x168] sm:$0xff]  ;;  %v2404_v25 = vld [vmem:[%s8366_s5 + $0x170] sm:$0xff]  ;;  %v2342_v54 = vld [vmem:[%s8365_s4 + $0x1d8] sm:$0xff] }
 0x1cd   :  { %v2227_v36 = vmax.f32 %v1971_v34, %v5351_v30  ;;  %v2183_v56 = vpop.f32.mrb[23].mxu1  ;;  %5466 = vmatprep.subr.mxu0 %v2297_v18  ;;  %5550 = vmatprep.subr.mxu1 %v2372_v20  ;;  %v6221_v24 = vpack.c.bf16 %v2404_v25, %v2403_v22  ;;  %v2331_v30 = vld [vmem:[%s8365_s4 + $0x180] sm:$0xff]  ;;  %v2415_v51 = vld [vmem:[%s8366_s5 + $0x1c8] sm:$0xff]  ;;  %v2417_v5 = vld [vmem:[%s8366_s5 + $0x1d8] sm:$0xff] }
 0x1ce   :  { %v7768_v59 = vadd.f32 %v7609_v31, %v2250_v9  ;;  %v2239_v29 = vmax.f32 %v2183_v56, %v5395_v33  ;;  %v2405_v9 = vld [vmem:[%s8366_s5 + $0x178] sm:$0xff]  ;;  %v2406_v33 = vld [vmem:[%s8366_s5 + $0x180] sm:$0xff]  ;;  %v6197_v34 = vpack.c.bf16 %v2331_v30, %v2330_v27  ;;  %v2332_v56 = vld [vmem:[%s8365_s4 + $0x188] sm:$0xff] }
 0x1cf   :  { %5467 = vmatpush3.msra.mxu0 %v2297_v18  ;;  %5551 = vmatpush3.msra.mxu1 %v2372_v20  ;;  %v2402_v18 = vld [vmem:[%s8366_s5 + $0x160] sm:$0xff]  ;;  %v2328_v20 = vld [vmem:[%s8365_s4 + $0x168] sm:$0xff]  ;;  %v2349_v27 = vld [vmem:[%s8365_s4 + $0x210] sm:$0xff] }
 0x1d0   :  { %v2251_v35 = vmax.f32 %v2227_v36, %v2239_v29  ;;  %5469 = vmatmul.mubr.msk.f32.vlgmr.msra.gmra.mrb[24].mxu0 %vm2433_vm4, %v7612_v55  ;;  %5553 = vmatmul.mubr.msk.f32.vlgmr.msra.gmra.mrb[24].mxu1 %vm2433_vm4, %v7612_v55  ;;  %v2318_v55 = vld [vmem:[%s8365_s4 + $0x118] sm:$0xff]  ;;  %v6193_v26 = vpack.c.bf16 %v2329_v21, %v2328_v20  ;;  %v6225_v36 = vpack.c.bf16 %v2406_v33, %v2405_v9  ;;  %v2344_v7 = vld [vmem:[%s8365_s4 + $0x1e8] sm:$0xff]  ;;  %v2347_v20 = vld [vmem:[%s8365_s4 + $0x200] sm:$0xff] }
 0x1d1   :  { %6138 = vmatprep.subr.bf16.mxu0 %v6137_v57  ;;  %6166 = vmatprep.subr.bf16.mxu1 %v6165_v58  ;;  %v6249_v11 = vpack.c.bf16 %v2344_v7, %v2343_v6  ;;  %v2348_v21 = vld [vmem:[%s8365_s4 + $0x208] sm:$0xff]  ;;  %v2422_v22 = vld [vmem:[%s8366_s5 + $0x200] sm:$0xff]  ;;  %v2350_v30 = vld [vmem:[%s8365_s4 + $0x218] sm:$0xff] }
 0x1d2   :  { %v7787_v38 = vadd.f32 %v7609_v31, %v2251_v35  ;;  %5471 = vmatprep.mubr.msk.f32.mxu0 %vm2433_vm4, %v7631_v37  ;;  %5555 = vmatprep.mubr.msk.f32.mxu1 %vm2433_vm4, %v7631_v37  ;;  %v6145_v31 = vpack.c.bf16 %v2318_v55, %v2317_v2  ;;  %v2409_v35 = vld [vmem:[%s8366_s5 + $0x198] sm:$0xff]  ;;  %v6205_v2 = vpack.c.bf16 %v2335_v62, %v2334_v61  ;;  %v2423_v25 = vld [vmem:[%s8366_s5 + $0x208] sm:$0xff]  ;;  %v2424_v9 = vld [vmem:[%s8366_s5 + $0x210] sm:$0xff] }
 0x1d3   :  { %6140 = vmatpush3.bf16.msra.mxu0 %v6137_v57  ;;  %6168 = vmatpush3.bf16.msra.mxu1 %v6165_v58  ;;  %v2333_v57 = vld [vmem:[%s8365_s4 + $0x190] sm:$0xff]  ;;  %v2407_v58 = vld [vmem:[%s8366_s5 + $0x188] sm:$0xff]  ;;  %v2425_v33 = vld [vmem:[%s8366_s5 + $0x218] sm:$0xff] }
 0x1d4   :  { %5472 = vmatmul.mubr.msk.f32.gmra.mrb[26].mxu0 %vm2433_vm4, %v7650_v48  ;;  %5556 = vmatmul.mubr.msk.f32.gmra.mrb[26].mxu1 %vm2433_vm4, %v7650_v48  ;;  %v6201_v29 = vpack.c.bf16 %v2333_v57, %v2332_v56  ;;  %v6229_v60 = vpack.c.bf16 %v2408_v28, %v2407_v58  ;;  %v6289_v56 = vpack.c.bf16 %v2425_v33, %v2424_v9  ;;  %v2352_v57 = vld [vmem:[%s8365_s4 + $0x228] sm:$0xff]  ;;  %v2426_v58 = vld [vmem:[%s8366_s5 + $0x220] sm:$0xff]  ;;  %v2354_v62 = vld [vmem:[%s8365_s4 + $0x238] sm:$0xff] }
 0x1d5   :  { %6142 = vmatprep.subr.bf16.mxu0 %v6141_v63  ;;  %6170 = vmatprep.subr.bf16.mxu1 %v6169_v1  ;;  %v2427_v28 = vld [vmem:[%s8366_s5 + $0x228] sm:$0xff]  ;;  %v3602_v6 = vld [vmem:[%s8368_s7 + $0x38] sm:$0xff]  ;;  %v8236_v9 = vld [vmem:[%s8369_s6] ss:$0 sm:$0xff] }
 0x1d6   :  { %5474 = vmatprep.mubr.msk.f32.mxu0 %vm2433_vm4, %v7669_v14  ;;  %5558 = vmatprep.mubr.msk.f32.mxu1 %vm2433_vm4, %v7669_v14  ;;  %v6293_v61 = vpack.c.bf16 %v2427_v28, %v2426_v58 }
 0x1d7   :  { %6144 = vmatpush3.bf16.msra.mxu0 %v6141_v63  ;;  %6172 = vmatpush3.bf16.msra.mxu1 %v6169_v1  ;;  %v2410_v63 = vld [vmem:[%s8366_s5 + $0x1a0] sm:$0xff]  ;;  %v2336_v1 = vld [vmem:[%s8365_s4 + $0x1a8] sm:$0xff] }
 0x1d8   :  { %5475 = vmatmul.mubr.msk.f32.gmra.mrb[28].mxu0 %vm2433_vm4, %v7688_v32  ;;  %5559 = vmatmul.mubr.msk.f32.gmra.mrb[28].mxu1 %vm2433_vm4, %v7688_v32  ;;  %v6233_v55 = vpack.c.bf16 %v2410_v63, %v2409_v35  ;;  %v6209_v40 = vpack.c.bf16 %v2337_v3, %v2336_v1  ;;  %v2428_v35 = vld [vmem:[%s8366_s5 + $0x230] sm:$0xff]  ;;  %v2429_v63 = vld [vmem:[%s8366_s5 + $0x238] sm:$0xff]  ;;  %v2356_v3 = vld [vmem:[%s8365_s4 + $0x248] sm:$0xff] }
 0x1d9   :  { %6146 = vmatprep.subr.bf16.mxu0 %v6145_v31  ;;  %6174 = vmatprep.subr.bf16.mxu1 %v6173_v39 }
 0x1da   :  { %5477 = vmatprep.mubr.msk.f32.mxu0 %vm2433_vm4, %v7707_v0  ;;  %5561 = vmatprep.mubr.msk.f32.mxu1 %vm2433_vm4, %v7707_v0 }
 0x1db   :  { %6148 = vmatpush3.bf16.msra.mxu0 %v6145_v31  ;;  %6176 = vmatpush3.bf16.msra.mxu1 %v6173_v39  ;;  %v2412_v31 = vld [vmem:[%s8366_s5 + $0x1b0] sm:$0xff]  ;;  %v7961_v39 = vmax.f32 %v7747_v23, 0.0  ;;  %v2338_v23 = vld [vmem:[%s8365_s4 + $0x1b8] sm:$0xff] }
 0x1dc   :  { %5478 = vmatmul.mubr.msk.f32.gmra.mrb[30].mxu0 %vm2433_vm4, %v7726_v49  ;;  %5562 = vmatmul.mubr.msk.f32.gmra.mrb[30].mxu1 %vm2433_vm4, %v7726_v49  ;;  %v6237_v41 = vpack.c.bf16 %v2412_v31, %v2411_v4  ;;  %v2430_v4 = vld [vmem:[%s8366_s5 + $0x240] sm:$0xff] }
 0x1dd   :  { %6150 = vmatprep.subr.bf16.mxu0 %v6149_v45  ;;  %6178 = vmatprep.subr.bf16.mxu1 %v6177_v46 }
 0x1de   :  { %5594 = vmatprep.mubr.msk.f32.mxu0 %vm2433_vm4, %v7631_v37  ;;  %5636 = vmatprep.mubr.msk.f32.mxu1 %vm2433_vm4, %v7631_v37  ;;  %v2401_v37 = vld [vmem:[%s8366_s5 + $0x158] sm:$0xff] }
 0x1df   :  { %6152 = vmatpush3.bf16.msra.mxu0 %v6149_v45  ;;  %6180 = vmatpush3.bf16.msra.mxu1 %v6177_v46  ;;  %v6189_v19 = vpack.c.bf16 %v2401_v37, %v2400_v15  ;;  %v6213_v45 = vpack.c.bf16 %v2339_v42, %v2338_v23  ;;  %v6241_v46 = vpack.c.bf16 %v2414_v44, %v2413_v43  ;;  %v2345_v15 = vld [vmem:[%s8365_s4 + $0x1f0] sm:$0xff]  ;;  %v2346_v37 = vld [vmem:[%s8365_s4 + $0x1f8] sm:$0xff]  ;;  %v3595_v42 = vld [vmem:[%s8368_s7] sm:$0xff] }
 0x1e0   :  { %6154 = vmatprep.subr.bf16.mxu0 %v6153_v52  ;;  %6182 = vmatprep.subr.bf16.mxu1 %v6181_v53  ;;  %v2432_v23 = vld [vmem:[%s8366_s5 + $0x250] sm:$0xff]  ;;  %v3596_v43 = vld [vmem:[%s8368_s7 + $0x8] sm:$0xff] }
 0x1e1   :  { %v3605_v44 = vld [vmem:[%s8368_s7 + $0x50] sm:$0xff] }
 0x1e3   :  { %6156 = vmatpush3.bf16.msra.mxu0 %v6153_v52  ;;  %6184 = vmatpush3.bf16.msra.mxu1 %v6181_v53  ;;  %v6217_v52 = vpack.c.bf16 %v2341_v50, %v2340_v47  ;;  %v3597_v47 = vld [vmem:[%s8368_s7 + $0x10] sm:$0xff] }
 0x1e4   :  { %6158 = vmatprep.subr.bf16.mxu0 %v6157_v8  ;;  %6186 = vmatprep.subr.bf16.mxu1 %v6185_v10 }
 0x1e7   :  { %6160 = vmatpush3.bf16.msra.mxu0 %v6157_v8  ;;  %6188 = vmatpush3.bf16.msra.mxu1 %v6185_v10  ;;  %v2418_v8 = vld [vmem:[%s8366_s5 + $0x1e0] sm:$0xff]  ;;  %v2419_v10 = vld [vmem:[%s8366_s5 + $0x1e8] sm:$0xff] }
 0x1e8   :  { %6162 = vmatprep.subr.bf16.mxu0 %v6161_v16  ;;  %6190 = vmatprep.subr.bf16.mxu1 %v6189_v19  ;;  %v6277_v13 = vpack.c.bf16 %v2419_v10, %v2418_v8  ;;  %v3610_v8 = vld [vmem:[%s8368_s7 + $0x78] sm:$0xff] }
 0x1eb   :  { %6164 = vmatpush3.bf16.msra.mxu0 %v6161_v16  ;;  %6192 = vmatpush3.bf16.msra.mxu1 %v6189_v19  ;;  %v2420_v16 = vld [vmem:[%s8366_s5 + $0x1f0] sm:$0xff]  ;;  %v2421_v19 = vld [vmem:[%s8366_s5 + $0x1f8] sm:$0xff] }
 0x1ec   :  { %5592 = vmatprep.subr.mxu0 %v2327_v17  ;;  %5634 = vmatprep.subr.mxu1 %v2402_v18 }
 0x1ef   :  { %5593 = vmatpush3.msra.mxu0 %v2327_v17  ;;  %5635 = vmatpush3.msra.mxu1 %v2402_v18  ;;  %v6253_v17 = vpack.c.bf16 %v2346_v37, %v2345_v15  ;;  %v6281_v18 = vpack.c.bf16 %v2421_v19, %v2420_v16  ;;  %v3611_v15 = vld [vmem:[%s8368_s7 + $0x80] sm:$0xff]  ;;  %v3612_v16 = vld [vmem:[%s8368_s7 + $0x88] sm:$0xff] }
 0x1f0   :  { %5595 = vmatmul.mubr.msk.f32.vlgmr.msra.gmra.mrb[24].mxu0 %vm2433_vm4, %v7650_v48  ;;  %5637 = vmatmul.mubr.msk.f32.vlgmr.msra.gmra.mrb[24].mxu1 %vm2433_vm4, %v7650_v48  ;;  %v6330_v19 = vpack.c.bf16 %v3612_v16, %v3611_v15  ;;  %v3624_v15 = vld [vmem:[%s8368_s7 + $0xe8] sm:$0xff] }
 0x1f1   :  { %6194 = vmatprep.subr.bf16.mxu0 %v6193_v26  ;;  %6222 = vmatprep.subr.bf16.mxu1 %v6221_v24  ;;  %v3632_v16 = vld [vmem:[%s8368_s7 + $0x128] sm:$0xff] }
 0x1f2   :  { %5597 = vmatprep.mubr.msk.f32.mxu0 %vm2433_vm4, %v7669_v14  ;;  %5639 = vmatprep.mubr.msk.f32.mxu1 %vm2433_vm4, %v7669_v14 }
 0x1f3   :  { %6196 = vmatpush3.bf16.msra.mxu0 %v6193_v26  ;;  %6224 = vmatpush3.bf16.msra.mxu1 %v6221_v24  ;;  %v6257_v26 = vpack.c.bf16 %v2348_v21, %v2347_v20  ;;  %v6285_v24 = vpack.c.bf16 %v2423_v25, %v2422_v22  ;;  %v6641_v21 = vmov 0.0  }
 0x1f4   :  { %5598 = vmatmul.mubr.msk.f32.gmra.mrb[26].mxu0 %vm2433_vm4, %v7688_v32  ;;  %5640 = vmatmul.mubr.msk.f32.gmra.mrb[26].mxu1 %vm2433_vm4, %v7688_v32 }
 0x1f5   :  { %6198 = vmatprep.subr.bf16.mxu0 %v6197_v34  ;;  %6226 = vmatprep.subr.bf16.mxu1 %v6225_v36 }
 0x1f6   :  { %5600 = vmatprep.mubr.msk.f32.mxu0 %vm2433_vm4, %v7707_v0  ;;  %5642 = vmatprep.mubr.msk.f32.mxu1 %vm2433_vm4, %v7707_v0 }
 0x1f7   :  { %6200 = vmatpush3.bf16.msra.mxu0 %v6197_v34  ;;  %6228 = vmatpush3.bf16.msra.mxu1 %v6225_v36  ;;  %v2351_v34 = vld [vmem:[%s8365_s4 + $0x220] sm:$0xff]  ;;  %v6261_v36 = vpack.c.bf16 %v2350_v30, %v2349_v27 }
 0x1f8   :  { %5601 = vmatmul.mubr.msk.f32.gmra.mrb[28].mxu0 %vm2433_vm4, %v7726_v49  ;;  %5643 = vmatmul.mubr.msk.f32.gmra.mrb[28].mxu1 %vm2433_vm4, %v7726_v49 }
 0x1f9   :  { %6202 = vmatprep.subr.bf16.mxu0 %v6201_v29  ;;  %6230 = vmatprep.subr.bf16.mxu1 %v6229_v60 }
 0x1fa   :  { %5603 = vmatprep.mubr.msk.f32.mxu0 %vm2433_vm4, %v7735_v12  ;;  %5645 = vmatprep.mubr.msk.f32.mxu1 %vm2433_vm4, %v7735_v12 }
 0x1fb   :  { %6204 = vmatpush3.bf16.msra.mxu0 %v6201_v29  ;;  %6232 = vmatpush3.bf16.msra.mxu1 %v6229_v60  ;;  %v8086_v29 = vmax.f32 %v7768_v59, 0.0  ;;  %v6265_v60 = vpack.c.bf16 %v2352_v57, %v2351_v34  ;;  %v2353_v59 = vld [vmem:[%s8365_s4 + $0x230] sm:$0xff]  ;;  %v3616_v57 = vld [vmem:[%s8368_s7 + $0xa8] sm:$0xff] }
 0x1fc   :  { %5604 = vmatmul.mubr.msk.f32.gmra.mrb[30].mxu0 %vm2433_vm4, %v7961_v39  ;;  %5646 = vmatmul.mubr.msk.f32.gmra.mrb[30].mxu1 %vm2433_vm4, %v7961_v39  ;;  %v6269_v1 = vpack.c.bf16 %v2354_v62, %v2353_v59  ;;  %v3617_v62 = vld [vmem:[%s8368_s7 + $0xb0] sm:$0xff] }
 0x1fd   :  { %6206 = vmatprep.subr.bf16.mxu0 %v6205_v2  ;;  %6234 = vmatprep.subr.bf16.mxu1 %v6233_v55 }
 0x1fe   :  { %5678 = vmatprep.mubr.msk.f32.mxu0 %vm2433_vm4, %v7650_v48  ;;  %5720 = vmatprep.mubr.msk.f32.mxu1 %vm2433_vm4, %v7650_v48  ;;  %v2416_v48 = vld [vmem:[%s8366_s5 + $0x1d0] sm:$0xff] }
 0x1ff   :  { %6208 = vmatpush3.bf16.msra.mxu0 %v6205_v2  ;;  %6236 = vmatpush3.bf16.msra.mxu1 %v6233_v55  ;;  %v6245_v53 = vpack.c.bf16 %v2416_v48, %v2415_v51  ;;  %v6297_v2 = vpack.c.bf16 %v2429_v63, %v2428_v35  ;;  %v2355_v55 = vld [vmem:[%s8365_s4 + $0x240] sm:$0xff]  ;;  %v3598_v51 = vld [vmem:[%s8368_s7 + $0x18] sm:$0xff] }
 0x200   :  { %6210 = vmatprep.subr.bf16.mxu0 %v6209_v40  ;;  %6238 = vmatprep.subr.bf16.mxu1 %v6237_v41  ;;  %v6273_v31 = vpack.c.bf16 %v2356_v3, %v2355_v55  ;;  %v3607_v48 = vld [vmem:[%s8368_s7 + $0x60] sm:$0xff]  ;;  %v3618_v55 = vld [vmem:[%s8368_s7 + $0xb8] sm:$0xff]  ;;  %v3625_v3 = vld [vmem:[%s8368_s7 + $0xf0] sm:$0xff] }
 0x203   :  { %6212 = vmatpush3.bf16.msra.mxu0 %v6209_v40  ;;  %6240 = vmatpush3.bf16.msra.mxu1 %v6237_v41  ;;  %v2357_v41 = vld [vmem:[%s8365_s4 + $0x250] sm:$0xff] }
 0x204   :  { %6214 = vmatprep.subr.bf16.mxu0 %v6213_v45  ;;  %6242 = vmatprep.subr.bf16.mxu1 %v6241_v46 }
 0x207   :  { %6216 = vmatpush3.bf16.msra.mxu0 %v6213_v45  ;;  %6244 = vmatpush3.bf16.msra.mxu1 %v6241_v46  ;;  %v3606_v45 = vld [vmem:[%s8368_s7 + $0x58] sm:$0xff]  ;;  %v6306_v46 = vpack.c.bf16 %v3596_v43, %v3595_v42  ;;  %v6339_v42 = vpack.c.bf16 %v3618_v55, %v3617_v62 }
 0x208   :  { %6218 = vmatprep.subr.bf16.mxu0 %v6217_v52  ;;  %6246 = vmatprep.subr.bf16.mxu1 %v6245_v53  ;;  %v6321_v50 = vpack.c.bf16 %v3606_v45, %v3605_v44  ;;  %v3619_v44 = vld [vmem:[%s8368_s7 + $0xc0] sm:$0xff] }
 0x20b   :  { %6220 = vmatpush3.bf16.msra.mxu0 %v6217_v52  ;;  %6248 = vmatpush3.bf16.msra.mxu1 %v6245_v53  ;;  %v3608_v52 = vld [vmem:[%s8368_s7 + $0x68] sm:$0xff]  ;;  %v6639_v53 = vmov 0.0|0.0  }
 0x20c   :  { %5676 = vmatprep.subr.mxu0 %v2342_v54  ;;  %5718 = vmatprep.subr.mxu1 %v2417_v5 }
 0x20f   :  { %5677 = vmatpush3.msra.mxu0 %v2342_v54  ;;  %5719 = vmatpush3.msra.mxu1 %v2417_v5  ;;  %v6324_v54 = vpack.c.bf16 %v3608_v52, %v3607_v48  ;;  %v3599_v5 = vld [vmem:[%s8368_s7 + $0x20] sm:$0xff]  ;;  %v3628_v52 = vld [vmem:[%s8368_s7 + $0x108] sm:$0xff] }
 0x210   :  { %5679 = vmatmul.mubr.msk.f32.vlgmr.msra.gmra.mrb[24].mxu0 %vm2433_vm4, %v7669_v14  ;;  %5721 = vmatmul.mubr.msk.f32.vlgmr.msra.gmra.mrb[24].mxu1 %vm2433_vm4, %v7669_v14  ;;  %v3627_v48 = vld [vmem:[%s8368_s7 + $0x100] sm:$0xff] }
 0x211   :  { %6250 = vmatprep.subr.bf16.mxu0 %v6249_v11  ;;  %6278 = vmatprep.subr.bf16.mxu1 %v6277_v13 }
 0x212   :  { %5681 = vmatprep.mubr.msk.f32.mxu0 %vm2433_vm4, %v7688_v32  ;;  %5723 = vmatprep.mubr.msk.f32.mxu1 %vm2433_vm4, %v7688_v32 }
 0x213   :  { %6252 = vmatpush3.bf16.msra.mxu0 %v6249_v11  ;;  %6280 = vmatpush3.bf16.msra.mxu1 %v6277_v13  ;;  %v3603_v11 = vld [vmem:[%s8368_s7 + $0x40] sm:$0xff]  ;;  %v3604_v13 = vld [vmem:[%s8368_s7 + $0x48] sm:$0xff] }
 0x214   :  { %5682 = vmatmul.mubr.msk.f32.gmra.mrb[26].mxu0 %vm2433_vm4, %v7707_v0  ;;  %5724 = vmatmul.mubr.msk.f32.gmra.mrb[26].mxu1 %vm2433_vm4, %v7707_v0  ;;  %v6318_v37 = vpack.c.bf16 %v3604_v13, %v3603_v11  ;;  %v3623_v13 = vld [vmem:[%s8368_s7 + $0xe0] sm:$0xff] }
 0x215   :  { %6254 = vmatprep.subr.bf16.mxu0 %v6253_v17  ;;  %6282 = vmatprep.subr.bf16.mxu1 %v6281_v18 }
 0x216   :  { %5684 = vmatprep.mubr.msk.f32.mxu0 %vm2433_vm4, %v7726_v49  ;;  %5726 = vmatprep.mubr.msk.f32.mxu1 %vm2433_vm4, %v7726_v49 }
 0x217   :  { %6256 = vmatpush3.bf16.msra.mxu0 %v6253_v17  ;;  %6284 = vmatpush3.bf16.msra.mxu1 %v6281_v18  ;;  %v3613_v17 = vld [vmem:[%s8368_s7 + $0x90] sm:$0xff]  ;;  %v3614_v18 = vld [vmem:[%s8368_s7 + $0x98] sm:$0xff] }
 0x218   :  { %5685 = vmatmul.mubr.msk.f32.gmra.mrb[28].mxu0 %vm2433_vm4, %v7735_v12  ;;  %5727 = vmatmul.mubr.msk.f32.gmra.mrb[28].mxu1 %vm2433_vm4, %v7735_v12  ;;  %v6333_v20 = vpack.c.bf16 %v3614_v18, %v3613_v17 }
 0x219   :  { %6258 = vmatprep.subr.bf16.mxu0 %v6257_v26  ;;  %6286 = vmatprep.subr.bf16.mxu1 %v6285_v24 }
 0x21a   :  { %5687 = vmatprep.mubr.msk.f32.mxu0 %vm2433_vm4, %v7961_v39  ;;  %5729 = vmatprep.mubr.msk.f32.mxu1 %vm2433_vm4, %v7961_v39 }
 0x21b   :  { %6260 = vmatpush3.bf16.msra.mxu0 %v6257_v26  ;;  %6288 = vmatpush3.bf16.msra.mxu1 %v6285_v24 }
 0x21c   :  { %5688 = vmatmul.mubr.msk.f32.gmra.mrb[30].mxu0 %vm2433_vm4, %v8086_v29  ;;  %5730 = vmatmul.mubr.msk.f32.gmra.mrb[30].mxu1 %vm2433_vm4, %v8086_v29 }
 0x21d   :  { %6262 = vmatprep.subr.bf16.mxu0 %v6261_v36  ;;  %6290 = vmatprep.subr.bf16.mxu1 %v6289_v56 }
 0x21e   :  { %5762 = vmatprep.mubr.msk.f32.mxu0 %vm2433_vm4, %v7669_v14  ;;  %5804 = vmatprep.mubr.msk.f32.mxu1 %vm2433_vm4, %v7669_v14  ;;  %v2431_v14 = vld [vmem:[%s8366_s5 + $0x248] sm:$0xff] }
 0x21f   :  { %6264 = vmatpush3.bf16.msra.mxu0 %v6261_v36  ;;  %6292 = vmatpush3.bf16.msra.mxu1 %v6289_v56  ;;  %v6301_v40 = vpack.c.bf16 %v2431_v14, %v2430_v4  ;;  %v3615_v56 = vld [vmem:[%s8368_s7 + $0xa0] sm:$0xff]  ;;  %v3626_v4 = vld [vmem:[%s8368_s7 + $0xf8] sm:$0xff] }
 0x220   :  { %6266 = vmatprep.subr.bf16.mxu0 %v6265_v60  ;;  %6294 = vmatprep.subr.bf16.mxu1 %v6293_v61  ;;  %v6336_v59 = vpack.c.bf16 %v3616_v57, %v3615_v56  ;;  %v6351_v43 = vpack.c.bf16 %v3626_v4, %v3625_v3  ;;  %v3949_v57 = vld [vmem:[%s8370_s9 + $0x20] sm:$0xff] }
 0x223   :  { %6268 = vmatpush3.bf16.msra.mxu0 %v6265_v60  ;;  %6296 = vmatpush3.bf16.msra.mxu1 %v6293_v61 }
 0x224   :  { %6270 = vmatprep.subr.bf16.mxu0 %v6269_v1  ;;  %6298 = vmatprep.subr.bf16.mxu1 %v6297_v2 }
 0x227   :  { %6272 = vmatpush3.bf16.msra.mxu0 %v6269_v1  ;;  %6300 = vmatpush3.bf16.msra.mxu1 %v6297_v2 }
 0x228   :  { %6274 = vmatprep.subr.bf16.mxu0 %v6273_v31  ;;  %6302 = vmatprep.subr.bf16.mxu1 %v6301_v40 }
 0x22b   :  { %6276 = vmatpush3.bf16.msra.mxu0 %v6273_v31  ;;  %6304 = vmatpush3.bf16.msra.mxu1 %v6301_v40 }
 0x22c   :  { %5760 = vmatprep.subr.mxu0 %v2357_v41  ;;  %5802 = vmatprep.subr.mxu1 %v2432_v23 }
 0x22f   :  { %5761 = vmatpush3.msra.mxu0 %v2357_v41  ;;  %5803 = vmatpush3.msra.mxu1 %v2432_v23 }
 0x230   :  { %5763 = vmatmul.mubr.msk.f32.vlgmr.msra.gmra.mrb[24].mxu0 %vm2433_vm4, %v7688_v32  ;;  %5805 = vmatmul.mubr.msk.f32.vlgmr.msra.gmra.mrb[24].mxu1 %vm2433_vm4, %v7688_v32  ;;  %v6309_v32 = vpack.c.bf16 %v3598_v51, %v3597_v47  ;;  %v3620_v51 = vld [vmem:[%s8368_s7 + $0xc8] sm:$0xff] }
 0x231   :  { %5765 = vmatprep.mubr.msk.f32.mxu0 %vm2433_vm4, %v7707_v0  ;;  %5807 = vmatprep.mubr.msk.f32.mxu1 %vm2433_vm4, %v7707_v0  ;;  %v3600_v0 = vld [vmem:[%s8368_s7 + $0x28] sm:$0xff] }
 0x232   :  { %6305 = vmatprep.subr.bf16.mxu0 %v6639_v53  ;;  %6320 = vmatprep.subr.bf16.mxu1 %v6639_v53 }
 0x233   :  { %6307 = vmatpush3.bf16.msra.mxu0 %v6306_v46  ;;  %6322 = vmatpush3.bf16.msra.mxu1 %v6321_v50 }
 0x234   :  { %5766 = vmatmul.mubr.msk.f32.gmra.mrb[26].mxu0 %vm2433_vm4, %v7726_v49  ;;  %5808 = vmatmul.mubr.msk.f32.gmra.mrb[26].mxu1 %vm2433_vm4, %v7726_v49  ;;  %v6312_v49 = vpack.c.bf16 %v3600_v0, %v3599_v5 }
 0x235   :  { %5768 = vmatprep.mubr.msk.f32.mxu0 %vm2433_vm4, %v7735_v12  ;;  %5810 = vmatprep.mubr.msk.f32.mxu1 %vm2433_vm4, %v7735_v12  ;;  %v2282_v12 = vmax.f32 %v7787_v38, 0.0  ;;  %v3609_v38 = vld [vmem:[%s8368_s7 + $0x70] sm:$0xff] }
 0x236   :  { %6308 = vmatprep.subr.bf16.mxu0 %v6639_v53  ;;  %6323 = vmatprep.subr.bf16.mxu1 %v6639_v53  ;;  %v6327_v10 = vpack.c.bf16 %v3610_v8, %v3609_v38  ;;  %v3622_v38 = vld [vmem:[%s8368_s7 + $0xd8] sm:$0xff] }
 0x237   :  { %6310 = vmatpush3.bf16.msra.mxu0 %v6309_v32  ;;  %6325 = vmatpush3.bf16.msra.mxu1 %v6324_v54  ;;  %v3630_v8 = vld [vmem:[%s8368_s7 + $0x118] sm:$0xff] }
 0x238   :  { %5769 = vmatmul.mubr.msk.f32.gmra.mrb[28].mxu0 %vm2433_vm4, %v7961_v39  ;;  %5811 = vmatmul.mubr.msk.f32.gmra.mrb[28].mxu1 %vm2433_vm4, %v7961_v39  ;;  %v3601_v39 = vld [vmem:[%s8368_s7 + $0x30] sm:$0xff] }
 0x239   :  { %5771 = vmatprep.mubr.msk.f32.mxu0 %vm2433_vm4, %v8086_v29  ;;  %5813 = vmatprep.mubr.msk.f32.mxu1 %vm2433_vm4, %v8086_v29  ;;  %v6315_v7 = vpack.c.bf16 %v3602_v6, %v3601_v39  ;;  %v3621_v39 = vld [vmem:[%s8368_s7 + $0xd0] sm:$0xff] }
 0x23a   :  { %6311 = vmatprep.subr.bf16.mxu0 %v6639_v53  ;;  %6326 = vmatprep.subr.bf16.mxu1 %v6639_v53 }
 0x23b   :  { %6313 = vmatpush3.bf16.msra.mxu0 %v6312_v49  ;;  %6328 = vmatpush3.bf16.msra.mxu1 %v6327_v10  ;;  %v6342_v49 = vpack.c.bf16 %v3620_v51, %v3619_v44  ;;  %v6345_v10 = vpack.c.bf16 %v3622_v38, %v3621_v39 }
 0x23c   :  { %5772 = vmatmul.mubr.msk.f32.gmra.mrb[30].mxu0 %vm2433_vm4, %v2282_v12  ;;  %5814 = vmatmul.mubr.msk.f32.gmra.mrb[30].mxu1 %vm2433_vm4, %v2282_v12  ;;  %v6354_v12 = vpack.c.bf16 %v3628_v52, %v3627_v48 }
 0x23d   :  { %6314 = vmatprep.subr.bf16.mxu0 %v6639_v53  ;;  %6329 = vmatprep.subr.bf16.mxu1 %v6639_v53 }
 0x23e   :  { %5836 = vmatprep.mubr.msk.f32.mxu0 %vm6640_vm5, %v6641_v21  ;;  %5859 = vmatprep.mubr.msk.f32.mxu1 %vm6640_vm5, %v6641_v21 }
 0x23f   :  { %6316 = vmatpush3.bf16.msra.mxu0 %v6315_v7  ;;  %6331 = vmatpush3.bf16.msra.mxu1 %v6330_v19  ;;  %v3629_v7 = vld [vmem:[%s8368_s7 + $0x110] sm:$0xff]  ;;  %v6348_v19 = vpack.c.bf16 %v3624_v15, %v3623_v13 }
 0x240   :  { %6317 = vmatprep.subr.bf16.mxu0 %v6639_v53  ;;  %6332 = vmatprep.subr.bf16.mxu1 %v6639_v53  ;;  %v6357_v11 = vpack.c.bf16 %v3630_v8, %v3629_v7 }
 0x243   :  { %6319 = vmatpush3.bf16.msra.mxu0 %v6318_v37  ;;  %6334 = vmatpush3.bf16.msra.mxu1 %v6333_v20  ;;  %v3631_v37 = vld [vmem:[%s8368_s7 + $0x120] sm:$0xff]  ;;  %v3633_v20 = vld [vmem:[%s8368_s7 + $0x130] sm:$0xff] }
 0x244   :  { %6335 = vmatprep.subr.bf16.mxu0 %v6639_v53  ;;  %6350 = vmatprep.subr.bf16.mxu1 %v6639_v53  ;;  %v6360_v17 = vpack.c.bf16 %v3632_v16, %v3631_v37 }
 0x303   :  { %v5764_v22 = vpop.f32.mrb[24].mxu0  ;;  %v5806_v25 = vpop.f32.mrb[24].mxu1 }
 0x304   :  { %v3408_v26 = vpop.f32.mrb[25].mxu0  ;;  %v3521_v24 = vpop.f32.mrb[25].mxu1 }
 0x305   :  { %v3568_v27 = vmax.f32 %v3408_v26, %v5764_v22  ;;  %v3572_v30 = vmax.f32 %v3521_v24, %v5806_v25  ;;  %v3634_v22 = vld [vmem:[%s8368_s7 + $0x138] sm:$0xff] }
 0x306   :  { %v6363_v25 = vpack.c.bf16 %v3634_v22, %v3633_v20 }
 0x307   :  { %v3576_v33 = vmax.f32 %v3568_v27, %v3572_v30  ;;  %v5767_v34 = vpop.f32.mrb[26].mxu0  ;;  %v5809_v36 = vpop.f32.mrb[26].mxu1  ;;  %v3945_v30 = vld [vmem:[%s8370_s9] sm:$0xff] }
 0x308   :  { %v3418_v58 = vpop.f32.mrb[27].mxu0  ;;  %v3531_v28 = vpop.f32.mrb[27].mxu1 }
 0x309   :  { %v3587_v29 = vadd.f32 %v8236_v9, %v3576_v33  ;;  %v3569_v60 = vmax.f32 %v3418_v58, %v5767_v34  ;;  %v3573_v61 = vmax.f32 %v3531_v28, %v5809_v36  ;;  %v3947_v34 = vld [vmem:[%s8370_s9 + $0x10] sm:$0xff]  ;;  %v3948_v36 = vld [vmem:[%s8370_s9 + $0x18] sm:$0xff]  ;;  %v3950_v58 = vld [vmem:[%s8370_s9 + $0x28] sm:$0xff] }
 0x30a   :  { %v6369_v56 = vpack.c.bf16 %v3948_v36, %v3947_v34  ;;  %v6372_v28 = vpack.c.bf16 %v3950_v58, %v3949_v57 }
 0x30b   :  { %v3591_v35 = vmax.f32 %v3587_v29, 0.0  ;;  %v3577_v63 = vmax.f32 %v3569_v60, %v3573_v61  ;;  %v5770_v1 = vpop.f32.mrb[28].mxu0  ;;  %v5812_v2 = vpop.f32.mrb[28].mxu1  ;;  %v3951_v29 = vld [vmem:[%s8370_s9 + $0x30] sm:$0x3] }
 0x30c   :  { %v3428_v14 = vpop.f32.mrb[29].mxu0  ;;  %v3541_v31 = vpop.f32.mrb[29].mxu1 }
 0x30d   :  { %v3588_v40 = vadd.f32 %v8236_v9, %v3577_v63  ;;  %v3570_v41 = vmax.f32 %v3428_v14, %v5770_v1  ;;  %v3574_v23 = vmax.f32 %v3541_v31, %v5812_v2  ;;  %5837 = vmatmul.mubr.msk.f32.vlgmr.msra.gmra.mrb[32].mxu0 %vm3635_vm6, %v3591_v35  ;;  %v4390_v14 = vld [vmem:[%s8371_s8] ss:$0 sm:$0xff] }
 0x30e   :  { %6337 = vmatpush3.bf16.msra.mxu0 %v6336_v59  ;;  %5882 = vmatprep.mubr.msk.f32.mxu0 %vm6640_vm5, %v6641_v21 }
 0x30f   :  { %v3592_v45 = vmax.f32 %v3588_v40, 0.0  ;;  %v3578_v46 = vmax.f32 %v3570_v41, %v3574_v23  ;;  %v5773_v47 = vpop.f32.mrb[30].mxu0  ;;  %v5815_v50 = vpop.f32.mrb[30].mxu1  ;;  %6338 = vmatprep.subr.bf16.mxu0 %v6639_v53 }
 0x310   :  { %v3438_v32 = vpop.f32.mrb[31].mxu0  ;;  %v3551_v54 = vpop.f32.mrb[31].mxu1 }
 0x311   :  { %v3571_v5 = vmax.f32 %v3438_v32, %v5773_v47  ;;  %v3575_v0 = vmax.f32 %v3551_v54, %v5815_v50  ;;  %5860 = vmatmul.mubr.msk.f32.vlgmr.msra.gmra.mrb[32].mxu1 %vm3635_vm6, %v3592_v45  ;;  %v3589_v18 = vadd.f32 %v8236_v9, %v3578_v46 }
 0x312   :  { %6340 = vmatpush3.bf16.msra.mxu0 %v6339_v42  ;;  %6352 = vmatpush3.bf16.msra.mxu1 %v6351_v43  ;;  %v4391_v42 = vld [vmem:[%s8372_s10] ss:$0 sm:$0xff] }
 0x313   :  { %v3579_v6 = vmax.f32 %v3571_v5, %v3575_v0  ;;  %6341 = vmatprep.subr.bf16.mxu0 %v6639_v53  ;;  %6353 = vmatprep.subr.bf16.mxu1 %v6639_v53  ;;  %v3593_v26 = vmax.f32 %v3589_v18, 0.0 }
 0x314   :  { %5905 = vmatprep.mubr.msk.f32.mxu1 %vm6640_vm5, %v6641_v21 }
 0x315   :  { %v3590_v24 = vadd.f32 %v8236_v9, %v3579_v6  ;;  %v3946_v9 = vld [vmem:[%s8370_s9 + $0x8] sm:$0xff] }
 0x316   :  { %6343 = vmatpush3.bf16.msra.mxu0 %v6342_v49  ;;  %6355 = vmatpush3.bf16.msra.mxu1 %v6354_v12  ;;  %v6366_v33 = vpack.c.bf16 %v3946_v9, %v3945_v30 }
 0x317   :  { %6344 = vmatprep.subr.bf16.mxu0 %v6639_v53  ;;  %6356 = vmatprep.subr.bf16.mxu1 %v6639_v53  ;;  %v3594_v27 = vmax.f32 %v3590_v24, 0.0 }
 0x31a   :  { %6346 = vmatpush3.bf16.msra.mxu0 %v6345_v10  ;;  %6358 = vmatpush3.bf16.msra.mxu1 %v6357_v11 }
 0x31b   :  { %6347 = vmatprep.subr.bf16.mxu0 %v6639_v53  ;;  %6359 = vmatprep.subr.bf16.mxu1 %v6639_v53 }
 0x31e   :  { %6349 = vmatpush3.bf16.msra.mxu0 %v6348_v19  ;;  %6361 = vmatpush3.bf16.msra.mxu1 %v6360_v17 }
 0x31f   :  { %6362 = vmatprep.subr.bf16.mxu1 %v6639_v53  ;;  %6365 = vmatprep.subr.bf16.mxu0 %v6639_v53 }
 0x321   :  { %5883 = vmatmul.mubr.msk.f32.vlgmr.msra.gmra.mrb[34].mxu0 %vm3635_vm6, %v3593_v26 }
 0x322   :  { %6364 = vmatpush3.bf16.msra.mxu1 %v6363_v25  ;;  %5922 = vmatprep.mubr.msk.f32.mxu0 %vm6640_vm5, %v6641_v21 }
 0x323   :  { %6367 = vmatpush3.bf16.msra.mxu0 %v6366_v33 }
 0x324   :  { %6368 = vmatprep.subr.bf16.mxu0 %v6639_v53 }
 0x325   :  { %5906 = vmatmul.mubr.msk.f32.vlgmr.msra.gmra.mrb[34].mxu1 %vm3635_vm6, %v3594_v27 }
 0x327   :  { %6370 = vmatpush3.bf16.msra.mxu0 %v6369_v56 }
 0x328   :  { %6371 = vmatprep.subr.bf16.mxu0 %v6639_v53 }
 0x32b   :  { %6373 = vmatpush3.bf16.msra.mxu0 %v6372_v28 }
 0x32c   :  { %5920 = vmatprep.subr.mxu0 %v6641_v21 }
 0x32f   :  { %5921 = vmatpush3.msk.msra.mxu0 %vm3962_vm7, %v3951_v29 }
 0x3e0   :  { %v3705_v60 = vpop.f32.mrb[32].mxu0 }
 0x3e1   :  { %v5838_v53 = vpop.f32.mrb[33].mxu0  ;;  %v3929_v59 = vsel %vm3928_vm8, %v3705_v60, 0.0 }
 0x3e4   :  { %v3778_v61 = vpop.f32.mrb[32].mxu1 }
 0x3e5   :  { %v3930_v62 = vsel %vm3928_vm8, %v3778_v61, 0.0  ;;  %v5861_v35 = vpop.f32.mrb[33].mxu1 }
 0x3e6   :  { %v3931_v63 = vadd.f32 %v3930_v62, %v3929_v59 }
 0x3f4   :  { %v3851_v1 = vpop.f32.mrb[34].mxu0 }
 0x3f5   :  { %v3932_v2 = vsel %vm3928_vm8, %v3851_v1, 0.0  ;;  %v5884_v21 = vpop.f32.mrb[35].mxu0 }
 0x3f6   :  { %v3933_v55 = vadd.f32 %v3932_v2, %v3931_v63 }
 0x3f8   :  { %v3924_v3 = vpop.f32.mrb[34].mxu1 }
 0x3f9   :  { %v3934_v4 = vsel %vm3928_vm8, %v3924_v3, 0.0  ;;  %v5907_v31 = vpop.f32.mrb[35].mxu1 }
 0x3fa   :  { %v3935_v40 = vadd.f32 %v3934_v4, %v3933_v55 }
 0x3fc   :  { %v3943_v41 = vadd.f32 %v4390_v14, %v3935_v40 }
 0x3fe   :  { %v3944_v23 = vmax.f32 %v3943_v41, 0.0 }
 0x400   :  { %5923 = vmatmul.mubr.msk.f32.vlgmr.msra.gmra.mrb[36].mxu0 %vm3928_vm8, %v3944_v23 }
 0x4d3   :  { %v4032_v43 = vpop.f32.mrb[36].mxu0 }
 0x4d4   :  { %v4033_v44 = vadd.f32 %v4391_v42, %v4032_v43  ;;  %v5924_v45 = vpop.f32.mrb[37].mxu0 }
 0x4d6   :  { %v4037_v46 = vsel %vm4036_vm9, %v4033_v44, -inf }
 0x4d7   :  { %4038 = vmax.xlane.f32.xlu0 %v4037_v46 }
 0x564   :  { %v4039_v47 = vpop.xlane.xlu0 %4038 }
 0x565   :  { %v4040_v50 = vsub.f32 %v4033_v44, %v4039_v47 }
 0x567   :  { %v4041_v51 = vmul.f32 1.442695, %v4040_v50 }
 0x569   :  { %6634 = vpow2.f32 %v4041_v51 }
 0x573   :  { %v6635_v48 = vpop.eup %6634 }
 0x574   :  { %v4043_v52 = vsel %vm4036_vm9, %v6635_v48, 0.0 }
 0x575   :  { %4044 = vadd.xlane.f32.xlu0 %v4043_v52 }
 0x602   :  { %v4045_v32 = vpop.xlane.xlu0 %4044 }
 0x603   :  { %6636 = vlog2.f32 %v4045_v32 }
 0x60d   :  { %v6637_v54 = vpop.eup %6636 }
 0x60e   :  { %v4047_v5 = vmul.f32 0.6931472, %v6637_v54 }
 0x610   :  { %v4048_v0 = vsub.f32 %v4040_v50, %v4047_v5 }
 0x612   :  { %4049 = vst.msk [vmem:[%s8373_s11] sm:$0xff] %vm4036_vm9, %v4048_v0 }

</bundles_post_ra>
